<compile_context>
chip_gen: v7x
topology: tpu7x:2x2x1
jax: 0.10.0
libtpu: 0.0.40
codegen_flags: <defaults>
</compile_context>

<pallas_src>
import functools

import jax
import jax.numpy as jnp
from jax.experimental import pallas as pl
from jax.experimental.pallas import tpu as pltpu


# ----------------------------------------------------------------------------
# Fused forward kernel: one grid step = one batch block through all stages.
# ----------------------------------------------------------------------------
def _fused_backbone_kernel(lat_ref, kvref_ref, audio_ref,
                           wqr_ref, bqr_ref,
                           wqa_ref, wkva_ref, bqa_ref, bkva_ref,
                           wqkvt_ref, bqkvt_ref,
                           out_ref, *, num_layers, inv_scale):
    BB, Sq, D = lat_ref.shape
    M = BB * Sq

    lat = lat_ref[...].astype(jnp.float32)                  # (BB, Sq, D) f32

    def attend(q_f32, k_bf, v_bf):
        # q: (BB, Sq, D) f32; k, v: (BB, Sk, D) bf16.  Softmax math stays f32.
        s = jnp.einsum("bqd,bkd->bqk", q_f32.astype(jnp.bfloat16), k_bf,
                       preferred_element_type=jnp.float32) * inv_scale
        s = s - jnp.max(s, axis=-1, keepdims=True)
        p = jnp.exp(s)
        p = p * pl.reciprocal(jnp.sum(p, axis=-1, keepdims=True), approx=True)
        return jnp.einsum("bqk,bkd->bqd", p.astype(jnp.bfloat16), v_bf,
                          preferred_element_type=jnp.float32)

    def project(x2d_bf, w_bf, b_f32):
        # (M, Din) bf16 @ (Din, Dout) bf16 -> f32 accumulate (+ f32 bias).
        return jnp.dot(x2d_bf, w_bf, preferred_element_type=jnp.float32) + b_f32

    # ---- Stage 1: reference-attention layers (KV pre-projected, lane dense).
    #      out = layer(lat, ref_feats) + lat  ==  2*lat + attn
    kv_all = kvref_ref[...]                                  # (BB, L*Skr, 2D) bf16
    skr = kv_all.shape[1] // num_layers
    for l in range(num_layers):
        q = project(lat.reshape(M, D).astype(jnp.bfloat16),
                    wqr_ref[l], bqr_ref[l]).reshape(BB, Sq, D)
        kv = kv_all[:, l * skr:(l + 1) * skr, :]
        lat = 2.0 * lat + attend(q, kv[..., :D], kv[..., D:])

    # ---- Stage 2: audio cross-attention (single fused layer, merged K|V).
    audio = audio_ref[...]                                   # (BB, Sa, D) bf16
    sa = audio.shape[1]
    q = project(lat.reshape(M, D).astype(jnp.bfloat16),
                wqa_ref[...], bqa_ref[...]).reshape(BB, Sq, D)
    kv = project(audio.reshape(BB * sa, D), wkva_ref[...],
                 bkva_ref[...]).reshape(BB, sa, 2 * D)
    lat = lat + attend(q, kv[..., :D].astype(jnp.bfloat16),
                       kv[..., D:].astype(jnp.bfloat16))

    # ---- Stage 3: temporal self-attention layers (merged Q|K|V matmul).
    for l in range(num_layers):
        qkv = project(lat.reshape(M, D).astype(jnp.bfloat16),
                      wqkvt_ref[l], bqkvt_ref[l]).reshape(BB, Sq, 3 * D)
        lat = lat + attend(qkv[..., :D],
                           qkv[..., D:2 * D].astype(jnp.bfloat16),
                           qkv[..., 2 * D:].astype(jnp.bfloat16))

    out_ref[...] = lat.astype(out_ref.dtype)


def fused_backbone(lat, kv_ref, audio, wq_r, bq_r, wq_a, wkv_a, bq_a, bkv_a,
                   wqkv_t, bqkv_t):
    """lat: (B,Sq,D) f32; kv_ref: (B, L*Skr, 2D) bf16; audio: (B,Sa,D) bf16."""
    B, Sq, D = lat.shape
    L = wq_r.shape[0]
    LSkr, D2 = kv_ref.shape[1], kv_ref.shape[2]
    Sa = audio.shape[1]
    D3 = wqkv_t.shape[-1]
    # >=2 parallel programs so v7x's two TensorCores both get work; on
    # v5e/v6e this is just one extra (cheap) serial grid step.
    NB = 2 if (B >= 2 and B % 2 == 0) else 1
    BB = B // NB
    inv_scale = 1.0 / (float(D) ** 0.5)
    kernel = functools.partial(_fused_backbone_kernel,
                               num_layers=L, inv_scale=inv_scale)
    return pl.pallas_call(
        kernel,
        out_shape=jax.ShapeDtypeStruct((B, Sq, D), lat.dtype),
        grid=(NB,),
        in_specs=[
            pl.BlockSpec((BB, Sq, D),    lambda g: (g, 0, 0)),    # latent
            pl.BlockSpec((BB, LSkr, D2), lambda g: (g, 0, 0)),    # ref KV (pre-proj)
            pl.BlockSpec((BB, Sa, D),    lambda g: (g, 0, 0)),    # audio feats
            pl.BlockSpec((L, D, D),      lambda g: (0, 0, 0)),    # Wq  (ref stack)
            pl.BlockSpec((L, 1, D),      lambda g: (0, 0, 0)),    # bq  (ref stack)
            pl.BlockSpec((D, D),         lambda g: (0, 0)),       # Wq  (audio)
            pl.BlockSpec((D, D2),        lambda g: (0, 0)),       # Wkv (audio)
            pl.BlockSpec((1, D),         lambda g: (0, 0)),       # bq  (audio)
            pl.BlockSpec((1, D2),        lambda g: (0, 0)),       # bkv (audio)
            pl.BlockSpec((L, D, D3),     lambda g: (0, 0, 0)),    # Wqkv (temporal)
            pl.BlockSpec((L, 1, D3),     lambda g: (0, 0, 0)),    # bqkv (temporal)
        ],
        out_specs=pl.BlockSpec((BB, Sq, D), lambda g: (g, 0, 0)),
        compiler_params=pltpu.CompilerParams(
            dimension_semantics=("parallel",)),
    )(lat, kv_ref, audio, wq_r, bq_r, wq_a, wkv_a, bq_a, bkv_a, wqkv_t, bqkv_t)


# ----------------------------------------------------------------------------
# Parameter construction (deterministic, synthetic) + packing for the kernel.
# nn.Linear (y = x W^T + b) stored directly in (in, out) layout.
# ----------------------------------------------------------------------------
def _attn_params(key, d):
    ks = jax.random.split(key, 6)
    s = 0.05
    return dict(
        wq=jax.random.normal(ks[0], (d, d), jnp.float32) * s,
        wk=jax.random.normal(ks[1], (d, d), jnp.float32) * s,
        wv=jax.random.normal(ks[2], (d, d), jnp.float32) * s,
        bq=jax.random.normal(ks[3], (1, d), jnp.float32) * s,
        bk=jax.random.normal(ks[4], (1, d), jnp.float32) * s,
        bv=jax.random.normal(ks[5], (1, d), jnp.float32) * s,
    )


def init_backbone_params(key, feature_dim, num_layers, ref_in_channels):
    keys = jax.random.split(key, 3 + 2 * num_layers)
    params = {}
    # TODO(synk): real reference_net is an SD-UNet (external to the source);
    # stood in by a learned per-token linear projection C -> feature_dim.
    params["ref_net"] = dict(
        w=jax.random.normal(keys[0], (ref_in_channels, feature_dim), jnp.float32) * 0.05,
        b=jax.random.normal(keys[1], (1, feature_dim), jnp.float32) * 0.05,
    )
    params["ref_attn"] = [_attn_params(keys[2 + i], feature_dim)
                          for i in range(num_layers)]
    # TODO(synk): audio_attention_layers is an external module; stood in by the
    # same fused cross-attention (latent attends to audio features) + residual.
    params["audio_attn"] = _attn_params(keys[2 + num_layers], feature_dim)
    # TODO(synk): VanillaTemporalModule (AnimateDiff) is external; stood in by
    # fused self-attention over the latent sequence + residual.
    params["temporal"] = [_attn_params(keys[3 + num_layers + i], feature_dim)
                          for i in range(num_layers)]
    # Round to bf16-representable values so the bf16 kernel path and the f32
    # reference use the same underlying numbers.
    return jax.tree_util.tree_map(
        lambda x: x.astype(jnp.bfloat16).astype(jnp.float32), params)


def pack_params(params):
    """Stack per-layer weights, merge K|V (and Q|K|V for temporal), fold the
    reference_net projection into the reference K/V weights, bf16 MXU weights,
    f32 biases (added to f32 accumulators)."""
    def stack(ps, name):
        return jnp.stack([p[name] for p in ps], axis=0)

    bf = lambda x: x.astype(jnp.bfloat16)

    wref = params["ref_net"]["w"]            # (C, D)
    bref = params["ref_net"]["b"]            # (1, D)

    ra = params["ref_attn"]
    wq = stack(ra, "wq"); wk = stack(ra, "wk"); wv = stack(ra, "wv")
    bq = stack(ra, "bq"); bk = stack(ra, "bk"); bv = stack(ra, "bv")
    # (toks@Wref + bref)@Wk + bk == toks@(Wref@Wk) + (bref@Wk + bk)
    wkv_ref = jnp.concatenate([jnp.einsum("cd,lde->lce", wref, wk),
                               jnp.einsum("cd,lde->lce", wref, wv)], axis=-1)
    bkv_ref = jnp.concatenate([jnp.einsum("od,lde->loe", bref, wk) + bk,
                               jnp.einsum("od,lde->loe", bref, wv) + bv], axis=-1)

    aa = params["audio_attn"]
    tm = params["temporal"]
    return {
        # wkv/bkv stay f32 — only used by the tiny XLA-side pre-projection.
        "ref_attn": dict(wq=bf(wq), bq=bq, wkv=wkv_ref, bkv=bkv_ref),
        "audio_attn": dict(
            wq=bf(aa["wq"]),
            wkv=bf(jnp.concatenate([aa["wk"], aa["wv"]], axis=-1)),
            bq=aa["bq"],
            bkv=jnp.concatenate([aa["bk"], aa["bv"]], axis=-1)),
        "temporal": dict(
            wqkv=bf(jnp.concatenate([stack(tm, "wq"), stack(tm, "wk"),
                                     stack(tm, "wv")], axis=-1)),
            bqkv=jnp.concatenate([stack(tm, "bq"), stack(tm, "bk"),
                                  stack(tm, "bv")], axis=-1)),
    }


# ----------------------------------------------------------------------------
# BackboneNetwork.forward
# ----------------------------------------------------------------------------
def backbone_forward(packed, latent_code, audio_features, ref_image):
    B, C, H, W = ref_image.shape
    # NCHW -> (B, H*W, C) token layout once at ingest.
    toks = jnp.transpose(ref_image, (0, 2, 3, 1)).reshape(B, H * W, C)
    toks = toks.astype(jnp.bfloat16).astype(jnp.float32)

    # Lane-sparse (Skr, C=4) reference projection (reference_net stand-in folded
    # into K/V) precomputed ONCE in XLA — the kernel only ever sees lane-dense
    # (Skr, 2D) bf16 KV blocks.
    p_ref = packed["ref_attn"]
    kv4 = jnp.einsum("bsc,lcd->blsd", toks, p_ref["wkv"]) + p_ref["bkv"][None]
    L = kv4.shape[1]
    kv_ref = kv4.reshape(B, L * (H * W), kv4.shape[-1]).astype(jnp.bfloat16)

    lat = latent_code.astype(jnp.float32)
    audio_bf = audio_features.astype(jnp.bfloat16)

    p_a = packed["audio_attn"]
    p_t = packed["temporal"]
    return fused_backbone(lat, kv_ref, audio_bf,
                          p_ref["wq"], p_ref["bq"],
                          p_a["wq"], p_a["wkv"], p_a["bq"], p_a["bkv"],
                          p_t["wqkv"], p_t["bqkv"])


# ----------------------------------------------------------------------------
# Pure-JAX reference (unfused, f32) for correctness check of the Pallas path.
# ----------------------------------------------------------------------------
def _ref_cross_attn(lat, feat, p):
    q = lat @ p["wq"] + p["bq"]
    k = feat @ p["wk"] + p["bk"]
    v = feat @ p["wv"] + p["bv"]
    s = jnp.einsum("bqd,bkd->bqk", q, k) / jnp.sqrt(jnp.float32(lat.shape[-1]))
    a = jax.nn.softmax(s, axis=-1)
    return lat + jnp.einsum("bqk,bkd->bqd", a, v)


def _ref_forward(params, latent, audio, ref_image):
    B, C, H, W = ref_image.shape
    toks = jnp.transpose(ref_image, (0, 2, 3, 1)).reshape(B, H * W, C)
    toks = toks.astype(jnp.bfloat16).astype(jnp.float32)
    audio = audio.astype(jnp.bfloat16).astype(jnp.float32)
    feats = toks @ params["ref_net"]["w"] + params["ref_net"]["b"]
    for p in params["ref_attn"]:
        latent = _ref_cross_attn(latent, feats, p) + latent
    latent = _ref_cross_attn(latent, audio, params["audio_attn"])
    for p in params["temporal"]:
        latent = _ref_cross_attn(latent, latent, p)
    return latent


if __name__ == "__main__":
    feature_dim = 128            # lane-dense (multiple of 128)
    num_layers = 2
    B, Sq, Sa = 2, 16, 16        # batch, latent tokens, audio tokens
    C, H, W = 4, 8, 8            # ref image NCHW -> 64 reference tokens

    key = jax.random.PRNGKey(0)
    kp, k1, k2, k3 = jax.random.split(key, 4)
    params = init_backbone_params(kp, feature_dim, num_layers, ref_in_channels=C)
    packed = pack_params(params)

    latent = jax.random.normal(k1, (B, Sq, feature_dim), jnp.float32)
    audio = jax.random.normal(k2, (B, Sa, feature_dim), jnp.float32)
    ref_image = jax.random.normal(k3, (B, C, H, W), jnp.float32)

    fwd = jax.jit(backbone_forward)
    out = jax.block_until_ready(fwd(packed, latent, audio, ref_image))

    ref = _ref_forward(params, latent, audio, ref_image)
    assert out.shape == (B, Sq, feature_dim)
    rel_err = jnp.linalg.norm(out.astype(jnp.float32) - ref) / jnp.linalg.norm(ref)
    assert float(rel_err) < 5e-2, f"relative error too large: {float(rel_err)}"

    print("KERNEL_OK")
</pallas_src>

<mosaic_0001>
module attributes {stable_mosaic.version = 11 : i64} {
  func.func @_fused_backbone_kernel(%arg0: i32, %arg1: memref<1x16x128xf32, #tpu.memory_space<vmem>>, %arg2: memref<1x128x256xbf16, #tpu.memory_space<vmem>>, %arg3: memref<1x16x128xbf16, #tpu.memory_space<vmem>>, %arg4: memref<2x128x128xbf16, #tpu.memory_space<vmem>>, %arg5: memref<2x1x128xf32, #tpu.memory_space<vmem>>, %arg6: memref<128x128xbf16, #tpu.memory_space<vmem>>, %arg7: memref<128x256xbf16, #tpu.memory_space<vmem>>, %arg8: memref<1x128xf32, #tpu.memory_space<vmem>>, %arg9: memref<1x256xf32, #tpu.memory_space<vmem>>, %arg10: memref<2x128x384xbf16, #tpu.memory_space<vmem>>, %arg11: memref<2x1x384xf32, #tpu.memory_space<vmem>>, %arg12: memref<1x16x128xf32, #tpu.memory_space<vmem>>) attributes {dimension_semantics = [#tpu.dimension_semantics<parallel>], iteration_bounds = array<i64: 2>, scalar_prefetch = 0 : i64, scratch_operands = 0 : i64, tpu.core_type = #tpu.core_type<tc>, window_params = [{transform_indices = @transform_0, window_bounds = array<i64: 1, 16, 128>}, {transform_indices = @transform_1, window_bounds = array<i64: 1, 128, 256>}, {transform_indices = @transform_2, window_bounds = array<i64: 1, 16, 128>}, {pipeline_mode = #tpu.pipeline_mode<synchronous>, transform_indices = @transform_3, window_bounds = array<i64: 2, 128, 128>}, {pipeline_mode = #tpu.pipeline_mode<synchronous>, transform_indices = @transform_4, window_bounds = array<i64: 2, 1, 128>}, {pipeline_mode = #tpu.pipeline_mode<synchronous>, transform_indices = @transform_5, window_bounds = array<i64: 128, 128>}, {pipeline_mode = #tpu.pipeline_mode<synchronous>, transform_indices = @transform_6, window_bounds = array<i64: 128, 256>}, {pipeline_mode = #tpu.pipeline_mode<synchronous>, transform_indices = @transform_7, window_bounds = array<i64: 1, 128>}, {pipeline_mode = #tpu.pipeline_mode<synchronous>, transform_indices = @transform_8, window_bounds = array<i64: 1, 256>}, {pipeline_mode = #tpu.pipeline_mode<synchronous>, transform_indices = @transform_9, window_bounds = array<i64: 2, 128, 384>}, {pipeline_mode = #tpu.pipeline_mode<synchronous>, transform_indices = @transform_10, window_bounds = array<i64: 2, 1, 384>}, {transform_indices = @transform_11, window_bounds = array<i64: 1, 16, 128>}]} {
    %c0 = arith.constant 0 : index
    %c0_0 = arith.constant 0 : index
    %c0_1 = arith.constant 0 : index
    %0 = vector.load %arg1[%c0, %c0_0, %c0_1] : memref<1x16x128xf32, #tpu.memory_space<vmem>>, vector<1x16x128xf32>
    %c0_2 = arith.constant 0 : index
    %c0_3 = arith.constant 0 : index
    %c0_4 = arith.constant 0 : index
    %1 = vector.load %arg2[%c0_2, %c0_3, %c0_4] : memref<1x128x256xbf16, #tpu.memory_space<vmem>>, vector<1x128x256xbf16>
    %2 = vector.shape_cast %0 : vector<1x16x128xf32> to vector<16x128xf32>
    %3 = arith.truncf %2 : vector<16x128xf32> to vector<16x128xbf16>
    %c0_5 = arith.constant 0 : index
    %c0_6 = arith.constant 0 : index
    %c0_7 = arith.constant 0 : index
    %4 = vector.load %arg4[%c0_5, %c0_6, %c0_7] : memref<2x128x128xbf16, #tpu.memory_space<vmem>>, vector<1x128x128xbf16>
    %5 = vector.shape_cast %4 : vector<1x128x128xbf16> to vector<128x128xbf16>
    %c0_8 = arith.constant 0 : index
    %c0_9 = arith.constant 0 : index
    %c0_10 = arith.constant 0 : index
    %6 = vector.load %arg5[%c0_8, %c0_9, %c0_10] : memref<2x1x128xf32, #tpu.memory_space<vmem>>, vector<1x1x128xf32>
    %7 = vector.shape_cast %6 : vector<1x1x128xf32> to vector<1x128xf32>
    %cst = arith.constant dense<0.000000e+00> : vector<16x128xf32>
    %8 = tpu.matmul %3, %5, %cst {dimension_numbers = #tpu.dot_dimension_numbers<[1], [0], [0], [1], [0, 0, 1, 1], [], []>} : vector<16x128xbf16>, vector<128x128xbf16>, vector<16x128xf32> -> vector<16x128xf32>
    %9 = vector.broadcast %7 : vector<1x128xf32> to vector<16x128xf32>
    %10 = arith.addf %8, %9 : vector<16x128xf32>
    %11 = vector.shape_cast %10 : vector<16x128xf32> to vector<1x16x128xf32>
    %12 = vector.extract_strided_slice %1 {offsets = [0, 0, 0], sizes = [1, 64, 256], strides = [1, 1, 1]} : vector<1x128x256xbf16> to vector<1x64x256xbf16>
    %cst_11 = arith.constant 2.000000e+00 : f32
    %13 = vector.broadcast %cst_11 : f32 to vector<1x16x128xf32>
    %14 = arith.mulf %13, %0 : vector<1x16x128xf32>
    %15 = vector.extract_strided_slice %12 {offsets = [0, 0, 0], sizes = [1, 64, 128], strides = [1, 1, 1]} : vector<1x64x256xbf16> to vector<1x64x128xbf16>
    %16 = vector.extract_strided_slice %12 {offsets = [0, 0, 128], sizes = [1, 64, 128], strides = [1, 1, 1]} : vector<1x64x256xbf16> to vector<1x64x128xbf16>
    %17 = arith.truncf %11 : vector<1x16x128xf32> to vector<1x16x128xbf16>
    "tpu.trace_start"() <{level = 10 : i32, message = "bqd,bkd->bqk"}> : () -> ()
    %cst_12 = arith.constant dense<0.000000e+00> : vector<1x16x64xf32>
    %18 = tpu.matmul %17, %15, %cst_12 {dimension_numbers = #tpu.dot_dimension_numbers<[2], [2], [1], [1], [0, 0, 0, 1, 1, 1], [0], [0]>} : vector<1x16x128xbf16>, vector<1x64x128xbf16>, vector<1x16x64xf32> -> vector<1x16x64xf32>
    "tpu.trace_stop"() : () -> ()
    %cst_13 = arith.constant 0.0883883461 : f32
    %19 = vector.broadcast %cst_13 : f32 to vector<1x16x64xf32>
    %20 = arith.mulf %18, %19 : vector<1x16x64xf32>
    %cst_14 = arith.constant dense<0xFF800000> : vector<1x16xf32>
    %21 = vector.multi_reduction <maximumf>, %20, %cst_14 [2] : vector<1x16x64xf32> to vector<1x16xf32>
    %22 = vector.shape_cast %21 : vector<1x16xf32> to vector<1x16x1xf32>
    %23 = vector.broadcast %22 : vector<1x16x1xf32> to vector<1x16x64xf32>
    %24 = arith.subf %20, %23 : vector<1x16x64xf32>
    %25 = math.exp %24 : vector<1x16x64xf32>
    %cst_15 = arith.constant dense<0.000000e+00> : vector<1x16xf32>
    %26 = vector.multi_reduction <add>, %25, %cst_15 [2] : vector<1x16x64xf32> to vector<1x16xf32>
    %27 = vector.shape_cast %26 : vector<1x16xf32> to vector<1x16x1xf32>
    %28 = tpu.reciprocal %27 {approx = true} : vector<1x16x1xf32> -> vector<1x16x1xf32>
    %29 = vector.broadcast %28 : vector<1x16x1xf32> to vector<1x16x64xf32>
    %30 = arith.mulf %25, %29 : vector<1x16x64xf32>
    %31 = arith.truncf %30 : vector<1x16x64xf32> to vector<1x16x64xbf16>
    "tpu.trace_start"() <{level = 10 : i32, message = "bqk,bkd->bqd"}> : () -> ()
    %cst_16 = arith.constant dense<0.000000e+00> : vector<1x16x128xf32>
    %32 = tpu.matmul %31, %16, %cst_16 {dimension_numbers = #tpu.dot_dimension_numbers<[2], [1], [1], [2], [0, 0, 0, 1, 1, 2], [0], [0]>} : vector<1x16x64xbf16>, vector<1x64x128xbf16>, vector<1x16x128xf32> -> vector<1x16x128xf32>
    "tpu.trace_stop"() : () -> ()
    %33 = arith.addf %14, %32 : vector<1x16x128xf32>
    %34 = vector.shape_cast %33 : vector<1x16x128xf32> to vector<16x128xf32>
    %35 = arith.truncf %34 : vector<16x128xf32> to vector<16x128xbf16>
    %c1 = arith.constant 1 : index
    %c0_17 = arith.constant 0 : index
    %c0_18 = arith.constant 0 : index
    %36 = vector.load %arg4[%c1, %c0_17, %c0_18] : memref<2x128x128xbf16, #tpu.memory_space<vmem>>, vector<1x128x128xbf16>
    %37 = vector.shape_cast %36 : vector<1x128x128xbf16> to vector<128x128xbf16>
    %c1_19 = arith.constant 1 : index
    %c0_20 = arith.constant 0 : index
    %c0_21 = arith.constant 0 : index
    %38 = vector.load %arg5[%c1_19, %c0_20, %c0_21] : memref<2x1x128xf32, #tpu.memory_space<vmem>>, vector<1x1x128xf32>
    %39 = vector.shape_cast %38 : vector<1x1x128xf32> to vector<1x128xf32>
    %cst_22 = arith.constant dense<0.000000e+00> : vector<16x128xf32>
    %40 = tpu.matmul %35, %37, %cst_22 {dimension_numbers = #tpu.dot_dimension_numbers<[1], [0], [0], [1], [0, 0, 1, 1], [], []>} : vector<16x128xbf16>, vector<128x128xbf16>, vector<16x128xf32> -> vector<16x128xf32>
    %41 = vector.broadcast %39 : vector<1x128xf32> to vector<16x128xf32>
    %42 = arith.addf %40, %41 : vector<16x128xf32>
    %43 = vector.shape_cast %42 : vector<16x128xf32> to vector<1x16x128xf32>
    %44 = vector.extract_strided_slice %1 {offsets = [0, 64, 0], sizes = [1, 64, 256], strides = [1, 1, 1]} : vector<1x128x256xbf16> to vector<1x64x256xbf16>
    %cst_23 = arith.constant 2.000000e+00 : f32
    %45 = vector.broadcast %cst_23 : f32 to vector<1x16x128xf32>
    %46 = arith.mulf %45, %33 : vector<1x16x128xf32>
    %47 = vector.extract_strided_slice %44 {offsets = [0, 0, 0], sizes = [1, 64, 128], strides = [1, 1, 1]} : vector<1x64x256xbf16> to vector<1x64x128xbf16>
    %48 = vector.extract_strided_slice %44 {offsets = [0, 0, 128], sizes = [1, 64, 128], strides = [1, 1, 1]} : vector<1x64x256xbf16> to vector<1x64x128xbf16>
    %49 = arith.truncf %43 : vector<1x16x128xf32> to vector<1x16x128xbf16>
    "tpu.trace_start"() <{level = 10 : i32, message = "bqd,bkd->bqk"}> : () -> ()
    %cst_24 = arith.constant dense<0.000000e+00> : vector<1x16x64xf32>
    %50 = tpu.matmul %49, %47, %cst_24 {dimension_numbers = #tpu.dot_dimension_numbers<[2], [2], [1], [1], [0, 0, 0, 1, 1, 1], [0], [0]>} : vector<1x16x128xbf16>, vector<1x64x128xbf16>, vector<1x16x64xf32> -> vector<1x16x64xf32>
    "tpu.trace_stop"() : () -> ()
    %cst_25 = arith.constant 0.0883883461 : f32
    %51 = vector.broadcast %cst_25 : f32 to vector<1x16x64xf32>
    %52 = arith.mulf %50, %51 : vector<1x16x64xf32>
    %cst_26 = arith.constant dense<0xFF800000> : vector<1x16xf32>
    %53 = vector.multi_reduction <maximumf>, %52, %cst_26 [2] : vector<1x16x64xf32> to vector<1x16xf32>
    %54 = vector.shape_cast %53 : vector<1x16xf32> to vector<1x16x1xf32>
    %55 = vector.broadcast %54 : vector<1x16x1xf32> to vector<1x16x64xf32>
    %56 = arith.subf %52, %55 : vector<1x16x64xf32>
    %57 = math.exp %56 : vector<1x16x64xf32>
    %cst_27 = arith.constant dense<0.000000e+00> : vector<1x16xf32>
    %58 = vector.multi_reduction <add>, %57, %cst_27 [2] : vector<1x16x64xf32> to vector<1x16xf32>
    %59 = vector.shape_cast %58 : vector<1x16xf32> to vector<1x16x1xf32>
    %60 = tpu.reciprocal %59 {approx = true} : vector<1x16x1xf32> -> vector<1x16x1xf32>
    %61 = vector.broadcast %60 : vector<1x16x1xf32> to vector<1x16x64xf32>
    %62 = arith.mulf %57, %61 : vector<1x16x64xf32>
    %63 = arith.truncf %62 : vector<1x16x64xf32> to vector<1x16x64xbf16>
    "tpu.trace_start"() <{level = 10 : i32, message = "bqk,bkd->bqd"}> : () -> ()
    %cst_28 = arith.constant dense<0.000000e+00> : vector<1x16x128xf32>
    %64 = tpu.matmul %63, %48, %cst_28 {dimension_numbers = #tpu.dot_dimension_numbers<[2], [1], [1], [2], [0, 0, 0, 1, 1, 2], [0], [0]>} : vector<1x16x64xbf16>, vector<1x64x128xbf16>, vector<1x16x128xf32> -> vector<1x16x128xf32>
    "tpu.trace_stop"() : () -> ()
    %65 = arith.addf %46, %64 : vector<1x16x128xf32>
    %c0_29 = arith.constant 0 : index
    %c0_30 = arith.constant 0 : index
    %c0_31 = arith.constant 0 : index
    %66 = vector.load %arg3[%c0_29, %c0_30, %c0_31] : memref<1x16x128xbf16, #tpu.memory_space<vmem>>, vector<1x16x128xbf16>
    %67 = vector.shape_cast %65 : vector<1x16x128xf32> to vector<16x128xf32>
    %68 = arith.truncf %67 : vector<16x128xf32> to vector<16x128xbf16>
    %c0_32 = arith.constant 0 : index
    %c0_33 = arith.constant 0 : index
    %69 = vector.load %arg6[%c0_32, %c0_33] : memref<128x128xbf16, #tpu.memory_space<vmem>>, vector<128x128xbf16>
    %c0_34 = arith.constant 0 : index
    %c0_35 = arith.constant 0 : index
    %70 = vector.load %arg8[%c0_34, %c0_35] : memref<1x128xf32, #tpu.memory_space<vmem>>, vector<1x128xf32>
    %cst_36 = arith.constant dense<0.000000e+00> : vector<16x128xf32>
    %71 = tpu.matmul %68, %69, %cst_36 {dimension_numbers = #tpu.dot_dimension_numbers<[1], [0], [0], [1], [0, 0, 1, 1], [], []>} : vector<16x128xbf16>, vector<128x128xbf16>, vector<16x128xf32> -> vector<16x128xf32>
    %72 = vector.broadcast %70 : vector<1x128xf32> to vector<16x128xf32>
    %73 = arith.addf %71, %72 : vector<16x128xf32>
    %74 = vector.shape_cast %73 : vector<16x128xf32> to vector<1x16x128xf32>
    %75 = vector.shape_cast %66 : vector<1x16x128xbf16> to vector<16x128xbf16>
    %c0_37 = arith.constant 0 : index
    %c0_38 = arith.constant 0 : index
    %76 = vector.load %arg7[%c0_37, %c0_38] : memref<128x256xbf16, #tpu.memory_space<vmem>>, vector<128x256xbf16>
    %c0_39 = arith.constant 0 : index
    %c0_40 = arith.constant 0 : index
    %77 = vector.load %arg9[%c0_39, %c0_40] : memref<1x256xf32, #tpu.memory_space<vmem>>, vector<1x256xf32>
    %cst_41 = arith.constant dense<0.000000e+00> : vector<16x256xf32>
    %78 = tpu.matmul %75, %76, %cst_41 {dimension_numbers = #tpu.dot_dimension_numbers<[1], [0], [0], [1], [0, 0, 1, 1], [], []>} : vector<16x128xbf16>, vector<128x256xbf16>, vector<16x256xf32> -> vector<16x256xf32>
    %79 = vector.broadcast %77 : vector<1x256xf32> to vector<16x256xf32>
    %80 = arith.addf %78, %79 : vector<16x256xf32>
    %81 = vector.shape_cast %80 : vector<16x256xf32> to vector<1x16x256xf32>
    %82 = vector.extract_strided_slice %81 {offsets = [0, 0, 0], sizes = [1, 16, 128], strides = [1, 1, 1]} : vector<1x16x256xf32> to vector<1x16x128xf32>
    %83 = arith.truncf %82 : vector<1x16x128xf32> to vector<1x16x128xbf16>
    %84 = vector.extract_strided_slice %81 {offsets = [0, 0, 128], sizes = [1, 16, 128], strides = [1, 1, 1]} : vector<1x16x256xf32> to vector<1x16x128xf32>
    %85 = arith.truncf %84 : vector<1x16x128xf32> to vector<1x16x128xbf16>
    %86 = arith.truncf %74 : vector<1x16x128xf32> to vector<1x16x128xbf16>
    "tpu.trace_start"() <{level = 10 : i32, message = "bqd,bkd->bqk"}> : () -> ()
    %cst_42 = arith.constant dense<0.000000e+00> : vector<1x16x16xf32>
    %87 = tpu.matmul %86, %83, %cst_42 {dimension_numbers = #tpu.dot_dimension_numbers<[2], [2], [1], [1], [0, 0, 0, 1, 1, 1], [0], [0]>} : vector<1x16x128xbf16>, vector<1x16x128xbf16>, vector<1x16x16xf32> -> vector<1x16x16xf32>
    "tpu.trace_stop"() : () -> ()
    %cst_43 = arith.constant 0.0883883461 : f32
    %88 = vector.broadcast %cst_43 : f32 to vector<1x16x16xf32>
    %89 = arith.mulf %87, %88 : vector<1x16x16xf32>
    %cst_44 = arith.constant dense<0xFF800000> : vector<1x16xf32>
    %90 = vector.multi_reduction <maximumf>, %89, %cst_44 [2] : vector<1x16x16xf32> to vector<1x16xf32>
    %91 = vector.shape_cast %90 : vector<1x16xf32> to vector<1x16x1xf32>
    %92 = vector.broadcast %91 : vector<1x16x1xf32> to vector<1x16x16xf32>
    %93 = arith.subf %89, %92 : vector<1x16x16xf32>
    %94 = math.exp %93 : vector<1x16x16xf32>
    %cst_45 = arith.constant dense<0.000000e+00> : vector<1x16xf32>
    %95 = vector.multi_reduction <add>, %94, %cst_45 [2] : vector<1x16x16xf32> to vector<1x16xf32>
    %96 = vector.shape_cast %95 : vector<1x16xf32> to vector<1x16x1xf32>
    %97 = tpu.reciprocal %96 {approx = true} : vector<1x16x1xf32> -> vector<1x16x1xf32>
    %98 = vector.broadcast %97 : vector<1x16x1xf32> to vector<1x16x16xf32>
    %99 = arith.mulf %94, %98 : vector<1x16x16xf32>
    %100 = arith.truncf %99 : vector<1x16x16xf32> to vector<1x16x16xbf16>
    "tpu.trace_start"() <{level = 10 : i32, message = "bqk,bkd->bqd"}> : () -> ()
    %cst_46 = arith.constant dense<0.000000e+00> : vector<1x16x128xf32>
    %101 = tpu.matmul %100, %85, %cst_46 {dimension_numbers = #tpu.dot_dimension_numbers<[2], [1], [1], [2], [0, 0, 0, 1, 1, 2], [0], [0]>} : vector<1x16x16xbf16>, vector<1x16x128xbf16>, vector<1x16x128xf32> -> vector<1x16x128xf32>
    "tpu.trace_stop"() : () -> ()
    %102 = arith.addf %65, %101 : vector<1x16x128xf32>
    %103 = vector.shape_cast %102 : vector<1x16x128xf32> to vector<16x128xf32>
    %104 = arith.truncf %103 : vector<16x128xf32> to vector<16x128xbf16>
    %c0_47 = arith.constant 0 : index
    %c0_48 = arith.constant 0 : index
    %c0_49 = arith.constant 0 : index
    %105 = vector.load %arg10[%c0_47, %c0_48, %c0_49] : memref<2x128x384xbf16, #tpu.memory_space<vmem>>, vector<1x128x384xbf16>
    %106 = vector.shape_cast %105 : vector<1x128x384xbf16> to vector<128x384xbf16>
    %c0_50 = arith.constant 0 : index
    %c0_51 = arith.constant 0 : index
    %c0_52 = arith.constant 0 : index
    %107 = vector.load %arg11[%c0_50, %c0_51, %c0_52] : memref<2x1x384xf32, #tpu.memory_space<vmem>>, vector<1x1x384xf32>
    %108 = vector.shape_cast %107 : vector<1x1x384xf32> to vector<1x384xf32>
    %cst_53 = arith.constant dense<0.000000e+00> : vector<16x384xf32>
    %109 = tpu.matmul %104, %106, %cst_53 {dimension_numbers = #tpu.dot_dimension_numbers<[1], [0], [0], [1], [0, 0, 1, 1], [], []>} : vector<16x128xbf16>, vector<128x384xbf16>, vector<16x384xf32> -> vector<16x384xf32>
    %110 = vector.broadcast %108 : vector<1x384xf32> to vector<16x384xf32>
    %111 = arith.addf %109, %110 : vector<16x384xf32>
    %112 = vector.shape_cast %111 : vector<16x384xf32> to vector<1x16x384xf32>
    %113 = vector.extract_strided_slice %112 {offsets = [0, 0, 0], sizes = [1, 16, 128], strides = [1, 1, 1]} : vector<1x16x384xf32> to vector<1x16x128xf32>
    %114 = vector.extract_strided_slice %112 {offsets = [0, 0, 128], sizes = [1, 16, 128], strides = [1, 1, 1]} : vector<1x16x384xf32> to vector<1x16x128xf32>
    %115 = arith.truncf %114 : vector<1x16x128xf32> to vector<1x16x128xbf16>
    %116 = vector.extract_strided_slice %112 {offsets = [0, 0, 256], sizes = [1, 16, 128], strides = [1, 1, 1]} : vector<1x16x384xf32> to vector<1x16x128xf32>
    %117 = arith.truncf %116 : vector<1x16x128xf32> to vector<1x16x128xbf16>
    %118 = arith.truncf %113 : vector<1x16x128xf32> to vector<1x16x128xbf16>
    "tpu.trace_start"() <{level = 10 : i32, message = "bqd,bkd->bqk"}> : () -> ()
    %cst_54 = arith.constant dense<0.000000e+00> : vector<1x16x16xf32>
    %119 = tpu.matmul %118, %115, %cst_54 {dimension_numbers = #tpu.dot_dimension_numbers<[2], [2], [1], [1], [0, 0, 0, 1, 1, 1], [0], [0]>} : vector<1x16x128xbf16>, vector<1x16x128xbf16>, vector<1x16x16xf32> -> vector<1x16x16xf32>
    "tpu.trace_stop"() : () -> ()
    %cst_55 = arith.constant 0.0883883461 : f32
    %120 = vector.broadcast %cst_55 : f32 to vector<1x16x16xf32>
    %121 = arith.mulf %119, %120 : vector<1x16x16xf32>
    %cst_56 = arith.constant dense<0xFF800000> : vector<1x16xf32>
    %122 = vector.multi_reduction <maximumf>, %121, %cst_56 [2] : vector<1x16x16xf32> to vector<1x16xf32>
    %123 = vector.shape_cast %122 : vector<1x16xf32> to vector<1x16x1xf32>
    %124 = vector.broadcast %123 : vector<1x16x1xf32> to vector<1x16x16xf32>
    %125 = arith.subf %121, %124 : vector<1x16x16xf32>
    %126 = math.exp %125 : vector<1x16x16xf32>
    %cst_57 = arith.constant dense<0.000000e+00> : vector<1x16xf32>
    %127 = vector.multi_reduction <add>, %126, %cst_57 [2] : vector<1x16x16xf32> to vector<1x16xf32>
    %128 = vector.shape_cast %127 : vector<1x16xf32> to vector<1x16x1xf32>
    %129 = tpu.reciprocal %128 {approx = true} : vector<1x16x1xf32> -> vector<1x16x1xf32>
    %130 = vector.broadcast %129 : vector<1x16x1xf32> to vector<1x16x16xf32>
    %131 = arith.mulf %126, %130 : vector<1x16x16xf32>
    %132 = arith.truncf %131 : vector<1x16x16xf32> to vector<1x16x16xbf16>
    "tpu.trace_start"() <{level = 10 : i32, message = "bqk,bkd->bqd"}> : () -> ()
    %cst_58 = arith.constant dense<0.000000e+00> : vector<1x16x128xf32>
    %133 = tpu.matmul %132, %117, %cst_58 {dimension_numbers = #tpu.dot_dimension_numbers<[2], [1], [1], [2], [0, 0, 0, 1, 1, 2], [0], [0]>} : vector<1x16x16xbf16>, vector<1x16x128xbf16>, vector<1x16x128xf32> -> vector<1x16x128xf32>
    "tpu.trace_stop"() : () -> ()
    %134 = arith.addf %102, %133 : vector<1x16x128xf32>
    %135 = vector.shape_cast %134 : vector<1x16x128xf32> to vector<16x128xf32>
    %136 = arith.truncf %135 : vector<16x128xf32> to vector<16x128xbf16>
    %c1_59 = arith.constant 1 : index
    %c0_60 = arith.constant 0 : index
    %c0_61 = arith.constant 0 : index
    %137 = vector.load %arg10[%c1_59, %c0_60, %c0_61] : memref<2x128x384xbf16, #tpu.memory_space<vmem>>, vector<1x128x384xbf16>
    %138 = vector.shape_cast %137 : vector<1x128x384xbf16> to vector<128x384xbf16>
    %c1_62 = arith.constant 1 : index
    %c0_63 = arith.constant 0 : index
    %c0_64 = arith.constant 0 : index
    %139 = vector.load %arg11[%c1_62, %c0_63, %c0_64] : memref<2x1x384xf32, #tpu.memory_space<vmem>>, vector<1x1x384xf32>
    %140 = vector.shape_cast %139 : vector<1x1x384xf32> to vector<1x384xf32>
    %cst_65 = arith.constant dense<0.000000e+00> : vector<16x384xf32>
    %141 = tpu.matmul %136, %138, %cst_65 {dimension_numbers = #tpu.dot_dimension_numbers<[1], [0], [0], [1], [0, 0, 1, 1], [], []>} : vector<16x128xbf16>, vector<128x384xbf16>, vector<16x384xf32> -> vector<16x384xf32>
    %142 = vector.broadcast %140 : vector<1x384xf32> to vector<16x384xf32>
    %143 = arith.addf %141, %142 : vector<16x384xf32>
    %144 = vector.shape_cast %143 : vector<16x384xf32> to vector<1x16x384xf32>
    %145 = vector.extract_strided_slice %144 {offsets = [0, 0, 0], sizes = [1, 16, 128], strides = [1, 1, 1]} : vector<1x16x384xf32> to vector<1x16x128xf32>
    %146 = vector.extract_strided_slice %144 {offsets = [0, 0, 128], sizes = [1, 16, 128], strides = [1, 1, 1]} : vector<1x16x384xf32> to vector<1x16x128xf32>
    %147 = arith.truncf %146 : vector<1x16x128xf32> to vector<1x16x128xbf16>
    %148 = vector.extract_strided_slice %144 {offsets = [0, 0, 256], sizes = [1, 16, 128], strides = [1, 1, 1]} : vector<1x16x384xf32> to vector<1x16x128xf32>
    %149 = arith.truncf %148 : vector<1x16x128xf32> to vector<1x16x128xbf16>
    %150 = arith.truncf %145 : vector<1x16x128xf32> to vector<1x16x128xbf16>
    "tpu.trace_start"() <{level = 10 : i32, message = "bqd,bkd->bqk"}> : () -> ()
    %cst_66 = arith.constant dense<0.000000e+00> : vector<1x16x16xf32>
    %151 = tpu.matmul %150, %147, %cst_66 {dimension_numbers = #tpu.dot_dimension_numbers<[2], [2], [1], [1], [0, 0, 0, 1, 1, 1], [0], [0]>} : vector<1x16x128xbf16>, vector<1x16x128xbf16>, vector<1x16x16xf32> -> vector<1x16x16xf32>
    "tpu.trace_stop"() : () -> ()
    %cst_67 = arith.constant 0.0883883461 : f32
    %152 = vector.broadcast %cst_67 : f32 to vector<1x16x16xf32>
    %153 = arith.mulf %151, %152 : vector<1x16x16xf32>
    %cst_68 = arith.constant dense<0xFF800000> : vector<1x16xf32>
    %154 = vector.multi_reduction <maximumf>, %153, %cst_68 [2] : vector<1x16x16xf32> to vector<1x16xf32>
    %155 = vector.shape_cast %154 : vector<1x16xf32> to vector<1x16x1xf32>
    %156 = vector.broadcast %155 : vector<1x16x1xf32> to vector<1x16x16xf32>
    %157 = arith.subf %153, %156 : vector<1x16x16xf32>
    %158 = math.exp %157 : vector<1x16x16xf32>
    %cst_69 = arith.constant dense<0.000000e+00> : vector<1x16xf32>
    %159 = vector.multi_reduction <add>, %158, %cst_69 [2] : vector<1x16x16xf32> to vector<1x16xf32>
    %160 = vector.shape_cast %159 : vector<1x16xf32> to vector<1x16x1xf32>
    %161 = tpu.reciprocal %160 {approx = true} : vector<1x16x1xf32> -> vector<1x16x1xf32>
    %162 = vector.broadcast %161 : vector<1x16x1xf32> to vector<1x16x16xf32>
    %163 = arith.mulf %158, %162 : vector<1x16x16xf32>
    %164 = arith.truncf %163 : vector<1x16x16xf32> to vector<1x16x16xbf16>
    "tpu.trace_start"() <{level = 10 : i32, message = "bqk,bkd->bqd"}> : () -> ()
    %cst_70 = arith.constant dense<0.000000e+00> : vector<1x16x128xf32>
    %165 = tpu.matmul %164, %149, %cst_70 {dimension_numbers = #tpu.dot_dimension_numbers<[2], [1], [1], [2], [0, 0, 0, 1, 1, 2], [0], [0]>} : vector<1x16x16xbf16>, vector<1x16x128xbf16>, vector<1x16x128xf32> -> vector<1x16x128xf32>
    "tpu.trace_stop"() : () -> ()
    %166 = arith.addf %134, %165 : vector<1x16x128xf32>
    %c0_71 = arith.constant 0 : index
    %c0_72 = arith.constant 0 : index
    %c0_73 = arith.constant 0 : index
    %167 = vector.load %arg12[%c0_71, %c0_72, %c0_73] : memref<1x16x128xf32, #tpu.memory_space<vmem>>, vector<1x16x128xf32>
    tpu.vector_store %arg12[%c0_71, %c0_72, %c0_73], %166 {strides = array<i32>} : memref<1x16x128xf32, #tpu.memory_space<vmem>>, vector<1x16x128xf32>,
    return
  }
  func.func @transform_0(%arg0: i32) -> (i32, i32, i32) {
    %c0_i32 = arith.constant 0 : i32
    %c0_i32_0 = arith.constant 0 : i32
    %c0_i32_1 = arith.constant 0 : i32
    return %arg0, %c0_i32, %c0_i32_0 : i32, i32, i32
  }
  func.func @transform_1(%arg0: i32) -> (i32, i32, i32) {
    %c0_i32 = arith.constant 0 : i32
    %c0_i32_0 = arith.constant 0 : i32
    %c0_i32_1 = arith.constant 0 : i32
    return %arg0, %c0_i32, %c0_i32_0 : i32, i32, i32
  }
  func.func @transform_2(%arg0: i32) -> (i32, i32, i32) {
    %c0_i32 = arith.constant 0 : i32
    %c0_i32_0 = arith.constant 0 : i32
    %c0_i32_1 = arith.constant 0 : i32
    return %arg0, %c0_i32, %c0_i32_0 : i32, i32, i32
  }
  func.func @transform_3(%arg0: i32) -> (i32, i32, i32) {
    %c0_i32 = arith.constant 0 : i32
    %c0_i32_0 = arith.constant 0 : i32
    %c0_i32_1 = arith.constant 0 : i32
    %c0_i32_2 = arith.constant 0 : i32
    return %c0_i32, %c0_i32_0, %c0_i32_1 : i32, i32, i32
  }
  func.func @transform_4(%arg0: i32) -> (i32, i32, i32) {
    %c0_i32 = arith.constant 0 : i32
    %c0_i32_0 = arith.constant 0 : i32
    %c0_i32_1 = arith.constant 0 : i32
    %c0_i32_2 = arith.constant 0 : i32
    return %c0_i32, %c0_i32_0, %c0_i32_1 : i32, i32, i32
  }
  func.func @transform_5(%arg0: i32) -> (i32, i32) {
    %c0_i32 = arith.constant 0 : i32
    %c0_i32_0 = arith.constant 0 : i32
    %c0_i32_1 = arith.constant 0 : i32
    return %c0_i32, %c0_i32_0 : i32, i32
  }
  func.func @transform_6(%arg0: i32) -> (i32, i32) {
    %c0_i32 = arith.constant 0 : i32
    %c0_i32_0 = arith.constant 0 : i32
    %c0_i32_1 = arith.constant 0 : i32
    return %c0_i32, %c0_i32_0 : i32, i32
  }
  func.func @transform_7(%arg0: i32) -> (i32, i32) {
    %c0_i32 = arith.constant 0 : i32
    %c0_i32_0 = arith.constant 0 : i32
    %c0_i32_1 = arith.constant 0 : i32
    return %c0_i32, %c0_i32_0 : i32, i32
  }
  func.func @transform_8(%arg0: i32) -> (i32, i32) {
    %c0_i32 = arith.constant 0 : i32
    %c0_i32_0 = arith.constant 0 : i32
    %c0_i32_1 = arith.constant 0 : i32
    return %c0_i32, %c0_i32_0 : i32, i32
  }
  func.func @transform_9(%arg0: i32) -> (i32, i32, i32) {
    %c0_i32 = arith.constant 0 : i32
    %c0_i32_0 = arith.constant 0 : i32
    %c0_i32_1 = arith.constant 0 : i32
    %c0_i32_2 = arith.constant 0 : i32
    return %c0_i32, %c0_i32_0, %c0_i32_1 : i32, i32, i32
  }
  func.func @transform_10(%arg0: i32) -> (i32, i32, i32) {
    %c0_i32 = arith.constant 0 : i32
    %c0_i32_0 = arith.constant 0 : i32
    %c0_i32_1 = arith.constant 0 : i32
    %c0_i32_2 = arith.constant 0 : i32
    return %c0_i32, %c0_i32_0, %c0_i32_1 : i32, i32, i32
  }
  func.func @transform_11(%arg0: i32) -> (i32, i32, i32) {
    %c0_i32 = arith.constant 0 : i32
    %c0_i32_0 = arith.constant 0 : i32
    %c0_i32_1 = arith.constant 0 : i32
    return %arg0, %c0_i32, %c0_i32_0 : i32, i32, i32
  }
}

</mosaic_0001>

<bundles_post_ra>
// kernel: backbone_forward.1
= control target key start
LH: loop header
LB: loop body
LE: loop exit
PB: predicated region body
PF: predicated region fallthrough
CT: control target
= control target key end

     0   :  { %s3660_s0 = inlined_call_operand.vmem [shape: f32[2,16,128], index: 0, kind: input, shape index: {}]   ;;  %s3661_s1 = inlined_call_operand.vmem [shape: bf16[2,128,256], index: 1, kind: input, shape index: {}]   ;;  %s3662_s2 = inlined_call_operand.vmem [shape: bf16[2,16,128], index: 2, kind: input, shape index: {}]   ;;  %s3663_s3 = inlined_call_operand.vmem [shape: bf16[2,128,128], index: 3, kind: input, shape index: {}]   ;;  %s3664_s4 = inlined_call_operand.vmem [shape: f32[2,1,128], index: 4, kind: input, shape index: {}]   ;;  %s3665_s5 = inlined_call_operand.vmem [shape: bf16[128,128], index: 5, kind: input, shape index: {}]   ;;  %s3666_s6 = inlined_call_operand.vmem [shape: bf16[128,256], index: 6, kind: input, shape index: {}]   ;;  %s3667_s7 = inlined_call_operand.vmem [shape: f32[1,128], index: 7, kind: input, shape index: {}]   ;;  %s3668_s8 = inlined_call_operand.vmem [shape: f32[1,256], index: 8, kind: input, shape index: {}]   ;;  %s3669_s9 = inlined_call_operand.vmem [shape: bf16[2,128,384], index: 9, kind: input, shape index: {}]   ;;  %s3670_s10 = inlined_call_operand.vmem [shape: f32[2,1,384], index: 10, kind: input, shape index: {}]   ;;  %s3671_s11 = inlined_call_operand.hbm [shape: f32[2,16,128], index: 11, kind: output, shape index: {}]  }
   0x1   :  { %3672 = sst [smem:[#allocation5_spill]] %s3660_s0 }
   0x2   :  { %16 = vsyncpa [#allocation3], 0 }
   0x3   :  { %18 = vsyncpa [#allocation3 + $0x1], 0  ;;  %s3024_s17 = smov 0   ;;  %s3026_s18 = smov 0  }
   0x4   :  { %s3028_s19 = smov 0   ;;  %s3030_s20 = smov 0  }
   0x5 LB: > { %s3045_s21 = sadd.s32 4294967295, %s2956_s20   ;;  %s2245_s22 = sadd.s32 4294967294, %s2956_s20   ;;  %s2956_s20 = sphi %s3030_s20, %s3679_s20   ;;  %s2952_s19 = sphi %s3028_s19, %s3678_s19   ;;  %s2948_s18 = sphi %s3026_s18, %s3677_s18   ;;  %s2944_s17 = sphi %s3024_s17, %s3676_s17  }
   0x6   : > { %s3049_s23 = sadd.s32 1, %s2956_s20   ;;  %s277_s24 = sadd.s32 1, %s2952_s19 }
   0x7   : > { %s274_s25 = ssub.s32 %s2956_s20, %s3049_s23  ;;  %p287_p0 = scmp.ne.s32.totalorder %s2952_s19, %s2948_s18 }
   0x8   : > { %p275_p1 = scmp.eq.s32.totalorder %s274_s25, 0  ;;  %p288_p2 = scmp.eq.s32.totalorder %s3045_s21, 1 }
   0x9   : > { %p293_p3 = scmp.ne.s32.totalorder %s2948_s18, %s2944_s17  ;;  %p294_p4 = scmp.eq.s32.totalorder %s2245_s22, 1 }
   0xa   : > { %s3060_s26 = scalar_select %p275_p1, %s2952_s19, %s277_s24  }
   0xb   : > { %p3062_p5 = por %p288_p2, %p287_p0  ;;  %p3066_p6 = por %p294_p4, %p293_p3 }
   0xc   : > { %p2248_p7 = scmp.ge.s32.totalorder %s2956_s20, 1  ;;  %p360_p8 = scmp.lt.s32.totalorder %s2956_s20, 3 }
   0xe   : > { %p361_p9 = pnand %p2248_p7, %p360_p8 }
   0xf   : > { %v2733_v0 = vld [vmem:[%s3663_s3] sm:$0xff] (!%p361_p9)   ;;  %v2958_v1 = vmov (!%p361_p9), 0.0   ;;  %v2734_v2 = vld [vmem:[%s3663_s3 + $0x8] sm:$0xff] (!%p361_p9)   ;;  %vm2959_vm0 = vmmov (!%p361_p9), 0   ;;  %p410_p10 = scmp.lt.s32.totalorder (!%p361_p9), %s3045_s21, 1  ;;  %v2735_v3 = vld [vmem:[%s3663_s3 + $0x10] sm:$0xff] (!%p361_p9)  }
  0x10   : > { %364 = sbr.rel (%p361_p9) target bundleno = 4919 (0x1337), region = 64  ;;  %2505 = vmatprep.subr.bf16.mxu0 (!%p361_p9), %v2958_v1  ;;  %2525 = vmatprep.subr.bf16.mxu1 (!%p361_p9), %v2958_v1  ;;  %v2736_v6 = vld [vmem:[%s3663_s3 + $0x18] sm:$0xff] (!%p361_p9)   ;;  %v2737_v10 = vld [vmem:[%s3663_s3 + $0x20] sm:$0xff] (!%p361_p9)   ;;  %v2738_v11 = vld [vmem:[%s3663_s3 + $0x28] sm:$0xff] (!%p361_p9)   ;;  %s3675_s0 = sld [smem:[#allocation5_spill]] (!%p361_p9)  ;;  %vm627_vm1 = vcmask (!%p361_p9), 523264  }
  0x11   : > { %2506 = vmatpush3.bf16.msra.mxu0 (!%p361_p9), %v2733_v0  ;;  %2521 = vmatprep.mubr.msk.bf16.mxu0 (!%p361_p9), %vm2959_vm0, %v2958_v1  ;;  %v2739_v15 = vld [vmem:[%s3663_s3 + $0x30] sm:$0xff] (!%p361_p9)   ;;  %v2740_v16 = vld [vmem:[%s3663_s3 + $0x38] sm:$0xff] (!%p361_p9)   ;;  %v2256_v27 = vld [vmem:[%s3664_s4] ss:$0 sm:$0xff] (!%p361_p9)  ;;  %vm1317_vm2 = vcmask (!%p361_p9), 130048   ;;  %s407_s30 = sand.u32 (!%p361_p9), 1, %s2948_s18  }
  0x12   : > { %2507 = vmatprep.subr.bf16.mxu0 (!%p361_p9), %v2958_v1  ;;  %2533 = vmatprep.mubr.msk.bf16.mxu1 (!%p361_p9), %vm2959_vm0, %v2958_v1  ;;  %v2745_v62 = vld [vmem:[%s3663_s3 + $0x40] sm:$0xff] (!%p361_p9)   ;;  %v2746_v63 = vld [vmem:[%s3663_s3 + $0x48] sm:$0xff] (!%p361_p9)   ;;  %v2747_v0 = vld [vmem:[%s3663_s3 + $0x50] sm:$0xff] (!%p361_p9)  }
  0x15   : > { %2508 = vmatpush3.bf16.msra.mxu0 (!%p361_p9), %v2734_v2  ;;  %v2748_v2 = vld [vmem:[%s3663_s3 + $0x58] sm:$0xff] (!%p361_p9)  }
  0x16   : > { %2509 = vmatprep.subr.bf16.mxu0 (!%p361_p9), %v2958_v1 }
  0x17   : > { %s3087_s14 = scalar_select %p410_p10, %s3045_s21, 1 }
  0x19   : > { %s2425_s22 = sshll.u32 %s3087_s14, 7  ;;  %2510 = vmatpush3.bf16.msra.mxu0 %v2735_v3  ;;  %s2424_s24 = sshll.u32 %s3087_s14, 4  ;;  %v2749_v3 = vld [vmem:[%s3663_s3 + $0x60] sm:$0xff]  }
  0x1a   : > { %s3097_s29 = scalar_lea.vmem %s3661_s1, %s2425_s22  ;;  %2511 = vmatprep.subr.bf16.mxu0 %v2958_v1  ;;  %s414_s15 = scalar_lea.vmem %s3675_s0, %s2424_s24 }
  0x1b   : > { %v428_v4 = vld [vmem:[%s3097_s29] sm:$0xff]  ;;  %v429_v5 = vld [vmem:[%s3097_s29 + $0x8] sm:$0xff]  ;;  %v3106_v8 = vld [vmem:[%s3097_s29 + $0x10] sm:$0xff]  ;;  %s2426_s24 = sshll.u32 %s3087_s14, 3 }
  0x1c   : > { %v2265_v7 = vcombine.low %v428_v4, %v429_v5  ;;  %v3109_v9 = vld [vmem:[%s3097_s29 + $0x18] sm:$0xff]  ;;  %v3124_v13 = vld [vmem:[%s3097_s29 + $0x20] sm:$0xff]  ;;  %v3127_v14 = vld [vmem:[%s3097_s29 + $0x28] sm:$0xff]  ;;  %v651_v19 = vrot.slane %v428_v4, 4  ;;  %v652_v21 = vrot.slane %v429_v5, 4  ;;  %v653_v53 = vrot.slane %v3106_v8, 4  ;;  %s3296_s12 = scalar_lea.vmem %s3662_s2, %s2426_s24 }
  0x1d   : > { %2512 = vmatpush3.bf16.msra.mxu0 %v2736_v6  ;;  %v2266_v12 = vcombine.low %v3106_v8, %v3109_v9  ;;  %v3140_v17 = vld [vmem:[%s414_s15] sm:$0xff]  ;;  %v3142_v18 = vld [vmem:[%s414_s15 + $0x8] sm:$0xff]  ;;  %v2267_v20 = vcombine.low %v3124_v13, %v3127_v14  ;;  %v434_v24 = vld [vmem:[%s3097_s29 + $0x30] sm:$0xff]  ;;  %v654_v54 = vrot.slane %v3109_v9, 4  ;;  %v655_v55 = vrot.slane %v3124_v13, 4  ;;  %s2427_s15 = sshll.u32 %s3045_s21, 8 }
  0x1e   : > { %2526 = vmatpush3.bf16.xpose.msra.mxu1 %v2265_v7  ;;  %2513 = vmatprep.subr.bf16.mxu0 %v2958_v1  ;;  %v444_v22 = vpack.c.bf16 %v3142_v18, %v3140_v17  ;;  %v2269_v23 = vcombine.low %v651_v19, %v652_v21  ;;  %v435_v25 = vld [vmem:[%s3097_s29 + $0x38] sm:$0xff]  ;;  %v656_v56 = vrot.slane %v3127_v14, 4  ;;  %v657_v58 = vrot.slane %v434_v24, 4  ;;  %v2750_v4 = vld [vmem:[%s3663_s3 + $0x68] sm:$0xff]   ;;  %v3209_v14 = vld [vmem:[%s3097_s29 + $0x40] sm:$0xff]  ;;  %s3616_s16 = scalar_lea.hbm %s3671_s11, %s2427_s15  ;;  %s3619_s21 = scalar_lea.sflag [#allocation3], %s407_s30 }
  0x1f   : > { %2527 = vmatprep.subr.bf16.mxu1 %v2958_v1  ;;  %v2268_v26 = vcombine.low %v434_v24, %v435_v25  ;;  %v2270_v57 = vcombine.low %v653_v53, %v654_v54  ;;  %v658_v59 = vrot.slane %v435_v25, 4  ;;  %v2752_v13 = vld [vmem:[%s3663_s3 + $0x78] sm:$0xff]   ;;  %v3218_v19 = vld [vmem:[%s3097_s29 + $0x50] sm:$0xff]  ;;  %v557_v25 = vmul.f32 2.0, %v3140_v17  ;;  %s2961_s24 = smov [#allocation2]  }
  0x20   : > { %v2271_v60 = vcombine.low %v655_v55, %v656_v56  ;;  %s2898_s25 = sshll.u32 %s2961_s24, 4  ;;  %s2899_s25 = int_to_ptr.vmem [resolvable:$false] %s2898_s25 }
  0x21   : > { %2514 = vmatpush3.bf16.msra.mxu0 %v2737_v10  ;;  %v2272_v61 = vcombine.low %v657_v58, %v658_v59 }
  0x22   : > { %2515 = vmatprep.subr.bf16.mxu0 %v2958_v1 }
  0x25   : > { %2516 = vmatpush3.bf16.msra.mxu0 %v2738_v11 }
  0x26   : > { %2528 = vmatpush3.bf16.xpose.msra.mxu1 %v2266_v12  ;;  %2517 = vmatprep.subr.bf16.mxu0 %v2958_v1  ;;  %v2751_v12 = vld [vmem:[%s3663_s3 + $0x70] sm:$0xff]  }
  0x27   : > { %2529 = vmatprep.subr.bf16.mxu1 %v2958_v1 }
  0x29   : > { %2518 = vmatpush3.bf16.msra.mxu0 %v2739_v15  ;;  %v3212_v15 = vld [vmem:[%s3097_s29 + $0x48] sm:$0xff] }
  0x2a   : > { %2519 = vmatprep.subr.bf16.mxu0 %v2958_v1 }
  0x2d   : > { %2520 = vmatpush3.bf16.msra.mxu0 %v2740_v16  ;;  %v2300_v16 = vcombine.low %v3209_v14, %v3212_v15 }
  0x2e   : > { %2530 = vmatpush3.bf16.xpose.msra.mxu1 %v2267_v20  ;;  %2537 = vmatprep.subr.bf16.mxu0 %v2958_v1  ;;  %v3221_v20 = vld [vmem:[%s3097_s29 + $0x58] sm:$0xff] }
  0x2f   : > { %2531 = vmatprep.subr.bf16.mxu1 %v2958_v1  ;;  %v2301_v21 = vcombine.low %v3218_v19, %v3221_v20 }
  0x30   : > { %2522 = vmatmul.mubr.bf16.vlgmr.msra.gmra.mrb[0].mxu0 %v444_v22  ;;  %v3227_v22 = vld [vmem:[%s3097_s29 + $0x60] sm:$0xff] }
  0x31   : > { %2538 = vmatpush3.bf16.msra.mxu0 %v2269_v23  ;;  %2545 = vmatprep.mubr.msk.bf16.mxu0 %vm2959_vm0, %v2958_v1  ;;  %v3230_v23 = vld [vmem:[%s3097_s29 + $0x68] sm:$0xff] }
  0x32   : > { %2539 = vmatprep.subr.bf16.mxu0 %v2958_v1  ;;  %v2302_v24 = vcombine.low %v3227_v22, %v3230_v23 }
  0x35   : > { %2540 = vmatpush3.bf16.msra.mxu0 %v2270_v57 }
  0x36   : > { %2532 = vmatpush3.bf16.xpose.msra.mxu1 %v2268_v26  ;;  %2541 = vmatprep.subr.bf16.mxu0 %v2958_v1  ;;  %v558_v26 = vmul.f32 2.0, %v3142_v18  ;;  %v2291_v18 = vld [vmem:[%s3664_s4 + $0x1] ss:$0 sm:$0xff] }
  0x37   : > { %2549 = vmatprep.subr.bf16.mxu1 %v2958_v1 }
  0x39   : > { %2542 = vmatpush3.bf16.msra.mxu0 %v2271_v60 }
  0x3a   : > { %2543 = vmatprep.subr.bf16.mxu0 %v2958_v1 }
  0x3d   : > { %2544 = vmatpush3.bf16.msra.mxu0 %v2272_v61  ;;  %v929_v61 = vrot.slane %v3209_v14, 4  ;;  %v2778_v14 = vld [vmem:[%s3665_s5 + $0x18] sm:$0xff]  }
  0x3e   : > { %2569 = vmatprep.subr.bf16.mxu0 %v2958_v1 }
 0x103   : > { %v550_v28 = vpop.f32.mrb[0].mxu0 }
 0x104   : > { %v2523_v29 = vpop.f32.mrb[1].mxu0  ;;  %v551_v31 = vadd.f32 %v2256_v27, %v550_v28 }
 0x105   : > { %v553_v30 = vpop.f32.mrb[2].mxu0 }
 0x106   : > { %v554_v32 = vadd.f32 %v2256_v27, %v553_v30  ;;  %v2524_v33 = vpop.f32.mrb[3].mxu0 }
 0x108   : > { %v559_v34 = vpack.c.bf16 %v554_v32, %v551_v31 }
 0x10a   : > { %2534 = vmatmul.mubr.bf16.vlgmr.msra.gmra.mrb[0].mxu1 %v559_v34  ;;  %v442_v34 = vld [vmem:[%s3097_s29 + $0x70] sm:$0xff] }
 0x10b   : > { %2565 = vmatprep.mubr.msk.bf16.mxu1 %vm2959_vm0, %v2958_v1  ;;  %2550 = vmatpush3.bf16.msra.mxu1 %v2745_v62  ;;  %v930_v62 = vrot.slane %v3212_v15, 4  ;;  %v2782_v15 = vld [vmem:[%s3665_s5 + $0x20] sm:$0xff]  }
 0x10c   : > { %2551 = vmatprep.subr.bf16.mxu1 %v2958_v1 }
 0x10f   : > { %2552 = vmatpush3.bf16.msra.mxu1 %v2746_v63  ;;  %v2304_v63 = vcombine.low %v929_v61, %v930_v62 }
 0x110   : > { %2553 = vmatprep.subr.bf16.mxu1 %v2958_v1 }
 0x113   : > { %2554 = vmatpush3.bf16.msra.mxu1 %v2747_v0  ;;  %v931_v0 = vrot.slane %v3218_v19, 4 }
 0x114   : > { %2555 = vmatprep.subr.bf16.mxu1 %v2958_v1 }
 0x117   : > { %2556 = vmatpush3.bf16.msra.mxu1 %v2748_v2  ;;  %v932_v2 = vrot.slane %v3221_v20, 4 }
 0x118   : > { %2557 = vmatprep.subr.bf16.mxu1 %v2958_v1 }
 0x11b   : > { %2558 = vmatpush3.bf16.msra.mxu1 %v2749_v3  ;;  %v2305_v3 = vcombine.low %v931_v0, %v932_v2 }
 0x11c   : > { %2559 = vmatprep.subr.bf16.mxu1 %v2958_v1 }
 0x11f   : > { %2560 = vmatpush3.bf16.msra.mxu1 %v2750_v4  ;;  %v933_v4 = vrot.slane %v3227_v22, 4 }
 0x120   : > { %2561 = vmatprep.subr.bf16.mxu1 %v2958_v1 }
 0x123   : > { %2562 = vmatpush3.bf16.msra.mxu1 %v2751_v12  ;;  %v2770_v12 = vld [vmem:[%s3665_s5 + $0x8] sm:$0xff]  }
 0x124   : > { %2563 = vmatprep.subr.bf16.mxu1 %v2958_v1 }
 0x127   : > { %2564 = vmatpush3.bf16.msra.mxu1 %v2752_v13  ;;  %v2774_v13 = vld [vmem:[%s3665_s5 + $0x10] sm:$0xff]  }
 0x128   : > { %2581 = vmatprep.subr.bf16.mxu1 %v2958_v1 }
 0x1dd   : > { %v618_v35 = vpop.f32.mrb[0].mxu1 }
 0x1de   : > { %v625_v36 = vmul.f32 0.088388346, %v618_v35  ;;  %v2535_v37 = vpop.f32.mrb[1].mxu1  ;;  %v443_v35 = vld [vmem:[%s3097_s29 + $0x78] sm:$0xff]  ;;  %s2249_s29 = sshll.u32 %s407_s30, 4 }
 0x1df   : > { %v621_v38 = vpop.f32.mrb[2].mxu1  ;;  %v2303_v17 = vcombine.low %v442_v34, %v443_v35  ;;  %s409_s13 = scalar_lea.vmem [#allocation2], %s2249_s29  ;;  %s2900_s29 = scalar_lea.vmem %s2899_s25, 512 }
 0x1e0   : > { %v626_v39 = vmul.f32 0.088388346, %v621_v38  ;;  %v2536_v40 = vpop.f32.mrb[3].mxu1  ;;  %v628_v41 = vsel %vm627_vm1, %v625_v36, -inf  ;;  %s2159_s14 = sshll.u32 %s409_s13, 4  ;;  %s3611_s14 = int_to_ptr.vmem [resolvable:$true] %s2159_s14 }
 0x1e1   : > { %629 = vmax.xlane.f32.xlu0 %v628_v41  ;;  %s2894_s22 = scalar_lea.vmem %s3611_s14, 256  ;;  %p2901_p0 = scmp.lt.s32.totalorder %s3611_s14, %s2899_s25 }
 0x1e2   : > { %v631_v42 = vsel %vm627_vm1, %v626_v39, -inf  ;;  %p2895_p11 = scmp.ne.s32.totalorder %s3611_s14, %s2894_s22  ;;  %p2902_p1 = scmp.lt.s32.totalorder %s2900_s29, %s2894_s22 }
 0x1e4   : > { %p2896_p12 = pnand %p2895_p11, %p3062_p5  ;;  %p2903_p2 = por %p2902_p1, %p2901_p0 }
 0x1e5   : > { %632 = vmax.xlane.f32.xlu0 %v631_v42 }
 0x1e6   : > { %p2897_p13 = pneg %p2896_p12 }
 0x1e8   : > { %p2904_p3 = pnand %p2903_p2, %p2897_p13 }
 0x26e   : > { %v630_v43 = vpop.xlane.xlu0 %629 }
 0x26f   : > { %v634_v44 = vsub.f32 %v625_v36, %v630_v43 }
 0x271   : > { %v636_v45 = vmul.f32 1.442695, %v634_v44 }
 0x272   : > { %v633_v46 = vpop.xlane.xlu0 %632 }
 0x273   : > { %2854 = vpow2.f32 %v636_v45  ;;  %v635_v47 = vsub.f32 %v626_v39, %v633_v46 }
 0x275   : > { %v638_v48 = vmul.f32 1.442695, %v635_v47 }
 0x277   : > { %2856 = vpow2.f32 %v638_v48 }
 0x27d   : > { %v2855_v49 = vpop.eup %2854 }
 0x27e   : > { %v640_v50 = vsel %vm627_vm1, %v2855_v49, 0.0 }
 0x27f   : > { %641 = vadd.xlane.f32.xlu1 %v640_v50 }
 0x281   : > { %v2857_v51 = vpop.eup %2856 }
 0x282   : > { %v643_v52 = vsel %vm627_vm1, %v2857_v51, 0.0 }
 0x283   : > { %644 = vadd.xlane.f32.xlu1 %v643_v52 }
 0x30c   : > { %v642_v5 = vpop.xlane.xlu1 %641 }
 0x30d   : > { %2858 = vrcp.f32 %v642_v5  ;;  %v934_v5 = vrot.slane %v3230_v23, 4 }
 0x310   : > { %v645_v6 = vpop.xlane.xlu1 %644 }
 0x311   : > { %2860 = vrcp.f32 %v645_v6  ;;  %v2306_v6 = vcombine.low %v933_v4, %v934_v5 }
 0x317   : > { %v2859_v7 = vpop.eup %2858 }
 0x318   : > { %v648_v9 = vmul.f32 %v2859_v7, %v2855_v49  ;;  %v935_v7 = vrot.slane %v442_v34, 4  ;;  %v2769_v34 = vld [vmem:[%s3666_s6 + $0x34] ss:$8 sps:$4 sm:$0xff]  }
 0x31b   : > { %v2861_v8 = vpop.eup %2860 }
 0x31c   : > { %v649_v10 = vmul.f32 %v2861_v8, %v2857_v51  ;;  %v936_v8 = vrot.slane %v443_v35, 4  ;;  %v2767_v35 = vld [vmem:[%s3666_s6 + $0x30] ss:$8 sps:$4 sm:$0xff]  }
 0x31e   : > { %v650_v11 = vpack.c.bf16 %v649_v10, %v648_v9  ;;  %v2307_v9 = vcombine.low %v935_v7, %v936_v8  ;;  %v2759_v10 = vld [vmem:[%s3666_s6 + $0x4] ss:$8 sps:$4 sm:$0xff]  }
 0x320   : > { %2546 = vmatmul.mubr.msk.bf16.vlgmr.msra.gmra.mrb[4].mxu0 %vm627_vm1, %v650_v11  ;;  %v2766_v11 = vld [vmem:[%s3665_s5] sm:$0xff]  }
 0x321   : > { %2577 = vmatprep.mubr.msk.bf16.mxu0 %vm2959_vm0, %v2958_v1  ;;  %2570 = vmatpush3.bf16.xpose.msra.mxu0 %v2300_v16  ;;  %v2786_v16 = vld [vmem:[%s3665_s5 + $0x28] sm:$0xff]  }
 0x322   : > { %2571 = vmatprep.subr.bf16.mxu0 %v2958_v1 }
 0x329   : > { %2572 = vmatpush3.bf16.xpose.msra.mxu0 %v2301_v21 }
 0x32a   : > { %2573 = vmatprep.subr.bf16.mxu0 %v2958_v1 }
 0x331   : > { %2574 = vmatpush3.bf16.xpose.msra.mxu0 %v2302_v24 }
 0x332   : > { %2575 = vmatprep.subr.bf16.mxu0 %v2958_v1 }
 0x339   : > { %2576 = vmatpush3.bf16.xpose.msra.mxu0 %v2303_v17  ;;  %v2773_v17 = vld [vmem:[%s3666_s6 + $0x44] ss:$8 sps:$4 sm:$0xff]  }
 0x33a   : > { %2593 = vmatprep.subr.bf16.mxu0 %v2958_v1 }
 0x3f3   : > { %v712_v27 = vpop.f32.mrb[4].mxu0 }
 0x3f4   : > { %v2547_v28 = vpop.f32.mrb[5].mxu0  ;;  %v3237_v30 = vadd.f32 %v712_v27, %v557_v25  ;;  %v2757_v25 = vld [vmem:[%s3666_s6] ss:$8 sps:$4 sm:$0xff]   ;;  %v2762_v27 = vld [vmem:[%s3666_s6 + $0x14] ss:$8 sps:$4 sm:$0xff]  }
 0x3f5   : > { %v715_v29 = vpop.f32.mrb[6].mxu0  ;;  %v2760_v28 = vld [vmem:[%s3666_s6 + $0x10] ss:$8 sps:$4 sm:$0xff]  }
 0x3f6   : > { %v3239_v31 = vadd.f32 %v715_v29, %v558_v26  ;;  %v2548_v32 = vpop.f32.mrb[7].mxu0  ;;  %v2960_v29 = vmov 0  }
 0x3f7   : > { %v2765_v32 = vld [vmem:[%s3666_s6 + $0x24] ss:$8 sps:$4 sm:$0xff]  }
 0x3f8   : > { %v721_v33 = vpack.c.bf16 %v3239_v31, %v3237_v30 }
 0x3fa   : > { %2566 = vmatmul.mubr.bf16.vlgmr.msra.gmra.mrb[4].mxu1 %v721_v33  ;;  %v2763_v33 = vld [vmem:[%s3666_s6 + $0x20] ss:$8 sps:$4 sm:$0xff]  }
 0x3fb   : > { %2589 = vmatprep.mubr.msk.bf16.mxu1 %vm2959_vm0, %v2958_v1  ;;  %2582 = vmatpush3.bf16.msra.mxu1 %v2304_v63 }
 0x3fc   : > { %2583 = vmatprep.subr.bf16.mxu1 %v2958_v1 }
 0x3ff   : > { %2584 = vmatpush3.bf16.msra.mxu1 %v2305_v3 }
 0x400   : > { %2585 = vmatprep.subr.bf16.mxu1 %v2958_v1 }
 0x403   : > { %2586 = vmatpush3.bf16.msra.mxu1 %v2306_v6  ;;  %v2309_v6 = vld [vmem:[%s3667_s7] ss:$0 sm:$0xff] }
 0x404   : > { %2587 = vmatprep.subr.bf16.mxu1 %v2958_v1 }
 0x407   : > { %2588 = vmatpush3.bf16.msra.mxu1 %v2307_v9 }
 0x408   : > { %1228 = vmatprep.subr.bf16.mxu1 %v2759_v10 }
 0x4cd   : > { %v829_v36 = vpop.f32.mrb[4].mxu1 }
 0x4ce   : > { %v2567_v37 = vpop.f32.mrb[5].mxu1  ;;  %v830_v39 = vadd.f32 %v2291_v18, %v829_v36  ;;  %v2777_v36 = vld [vmem:[%s3666_s6 + $0x54] ss:$8 sps:$4 sm:$0xff]  }
 0x4cf   : > { %v832_v38 = vpop.f32.mrb[6].mxu1  ;;  %v2775_v37 = vld [vmem:[%s3666_s6 + $0x50] ss:$8 sps:$4 sm:$0xff]  }
 0x4d0   : > { %v833_v40 = vadd.f32 %v2291_v18, %v832_v38  ;;  %v2568_v41 = vpop.f32.mrb[7].mxu1  ;;  %v2771_v18 = vld [vmem:[%s3666_s6 + $0x40] ss:$8 sps:$4 sm:$0xff]   ;;  %v2781_v38 = vld [vmem:[%s3666_s6 + $0x64] ss:$8 sps:$4 sm:$0xff]  }
 0x4d1   : > { %v2783_v41 = vld [vmem:[%s3666_s6 + $0x70] ss:$8 sps:$4 sm:$0xff]  }
 0x4d2   : > { %v838_v42 = vpack.c.bf16 %v833_v40, %v830_v39  ;;  %v2779_v39 = vld [vmem:[%s3666_s6 + $0x60] ss:$8 sps:$4 sm:$0xff]   ;;  %v2785_v40 = vld [vmem:[%s3666_s6 + $0x74] ss:$8 sps:$4 sm:$0xff]  }
 0x4d4   : > { %2578 = vmatmul.mubr.bf16.vlgmr.msra.gmra.mrb[8].mxu0 %v838_v42  ;;  %v2787_v42 = vld [vmem:[%s3296_s12] sm:$0xff]  }
 0x4d5   : > { %2609 = vmatprep.mubr.msk.bf16.mxu0 %vm2959_vm0, %v2958_v1  ;;  %2594 = vmatpush3.bf16.msra.mxu0 %v2766_v11 }
 0x4d6   : > { %2595 = vmatprep.subr.bf16.mxu0 %v2958_v1 }
 0x4d9   : > { %2596 = vmatpush3.bf16.msra.mxu0 %v2770_v12 }
 0x4da   : > { %2597 = vmatprep.subr.bf16.mxu0 %v2958_v1 }
 0x4dd   : > { %2598 = vmatpush3.bf16.msra.mxu0 %v2774_v13 }
 0x4de   : > { %2599 = vmatprep.subr.bf16.mxu0 %v2958_v1 }
 0x4e1   : > { %2600 = vmatpush3.bf16.msra.mxu0 %v2778_v14 }
 0x4e2   : > { %2601 = vmatprep.subr.bf16.mxu0 %v2958_v1 }
 0x4e5   : > { %2602 = vmatpush3.bf16.msra.mxu0 %v2782_v15 }
 0x4e6   : > { %2603 = vmatprep.subr.bf16.mxu0 %v2958_v1 }
 0x4e9   : > { %2604 = vmatpush3.bf16.msra.mxu0 %v2786_v16 }
 0x4ea   : > { %2605 = vmatprep.subr.bf16.mxu0 %v2958_v1 }
 0x5a7   : > { %v897_v43 = vpop.f32.mrb[8].mxu0 }
 0x5a8   : > { %v904_v44 = vmul.f32 0.088388346, %v897_v43  ;;  %v2579_v45 = vpop.f32.mrb[9].mxu0  ;;  %v2788_v43 = vld [vmem:[%s3665_s5 + $0x30] sm:$0xff]  }
 0x5a9   : > { %v900_v46 = vpop.f32.mrb[10].mxu0  ;;  %2606 = vmatpush3.bf16.msra.mxu0 %v2788_v43  ;;  %v836_v45 = vmul.f32 2.0, %v3237_v30  ;;  %v2808_v43 = vld [vmem:[%s3669_s9 + $0x64] ss:$12 sps:$4 sm:$0xff]  }
 0x5aa   : > { %v905_v47 = vmul.f32 0.088388346, %v900_v46  ;;  %v2580_v48 = vpop.f32.mrb[11].mxu0  ;;  %v906_v49 = vsel %vm627_vm1, %v904_v44, -inf  ;;  %2607 = vmatprep.subr.bf16.mxu0 %v2958_v1 }
 0x5ab   : > { %907 = vmax.xlane.f32.xlu0 %v906_v49  ;;  %v837_v49 = vmul.f32 2.0, %v3239_v31  ;;  %v1130_v31 = vld [vmem:[%s3668_s8] sm:$0x3] }
 0x5ac   : > { %v909_v50 = vsel %vm627_vm1, %v905_v47, -inf }
 0x5ad   : > { %910 = vmax.xlane.f32.xlu1 %v909_v50 }
 0x638   : > { %v908_v51 = vpop.xlane.xlu0 %907 }
 0x639   : > { %v912_v52 = vsub.f32 %v904_v44, %v908_v51  ;;  %v2789_v44 = vld [vmem:[%s3665_s5 + $0x38] sm:$0xff]  }
 0x63a   : > { %v911_v53 = vpop.xlane.xlu1 %910  ;;  %2608 = vmatpush3.bf16.msra.mxu0 %v2789_v44  ;;  %v2806_v44 = vld [vmem:[%s3669_s9 + $0x60] ss:$12 sps:$4 sm:$0xff]  }
 0x63b   : > { %v914_v54 = vmul.f32 1.442695, %v912_v52  ;;  %v913_v55 = vsub.f32 %v905_v47, %v911_v53  ;;  %2613 = vmatprep.subr.bf16.mxu0 %v2958_v1 }
 0x63d   : > { %2862 = vpow2.f32 %v914_v54  ;;  %v916_v56 = vmul.f32 1.442695, %v913_v55  ;;  %v1132_v54 = vlaneseq }
 0x63f   : > { %2864 = vpow2.f32 %v916_v56  ;;  %v3368_v55 = vshrl.u32 %v1132_v54, 7 }
 0x641   : > { %v3371_v30 = vsub.s32 0, %v3368_v55  ;;  %v3377_v56 = vsub.s32 1, %v3368_v55 }
 0x647   : > { %v2863_v57 = vpop.eup %2862 }
 0x648   : > { %v918_v58 = vsel %vm627_vm1, %v2863_v57, 0.0 }
 0x649   : > { %v2865_v59 = vpop.eup %2864  ;;  %919 = vadd.xlane.f32.xlu0 %v918_v58  ;;  %v1139_v58 = vrot.slane %v1130_v31, %v3377_v56 }
 0x64a   : > { %v921_v60 = vsel %vm627_vm1, %v2865_v59, 0.0 }
 0x64b   : > { %922 = vadd.xlane.f32.xlu1 %v921_v60 }
 0x6d6   : > { %v920_v19 = vpop.xlane.xlu0 %919 }
 0x6d7   : > { %2866 = vrcp.f32 %v920_v19 }
 0x6d8   : > { %v923_v20 = vpop.xlane.xlu1 %922 }
 0x6d9   : > { %2868 = vrcp.f32 %v923_v20 }
 0x6e1   : > { %v2867_v21 = vpop.eup %2866 }
 0x6e2   : > { %v926_v23 = vmul.f32 %v2867_v21, %v2863_v57  ;;  %v1135_v57 = vrot.slane %v1130_v31, %v3371_v30 }
 0x6e3   : > { %v2869_v22 = vpop.eup %2868 }
 0x6e4   : > { %v927_v24 = vmul.f32 %v2869_v22, %v2865_v59 }
 0x6e6   : > { %v928_v26 = vpack.c.bf16 %v927_v24, %v926_v23 }
 0x6e8   : > { %2590 = vmatmul.mubr.msk.bf16.vlgmr.msra.gmra.mrb[8].mxu1 %vm627_vm1, %v928_v26 }
 0x6e9   : > { %1229 = vmatpush1.bf16.msra.mxu1 %v2757_v25  ;;  %1260 = vmatprep.mubr.bf16.mxu1 %v2960_v29 }
 0x6ea   : > { %1230 = vmatprep.subr.bf16.mxu1 %v2762_v27 }
 0x6ed   : > { %1231 = vmatpush1.bf16.msra.mxu1 %v2760_v28 }
 0x6ee   : > { %1232 = vmatprep.subr.bf16.mxu1 %v2765_v32 }
 0x6f1   : > { %1233 = vmatpush1.bf16.msra.mxu1 %v2763_v33 }
 0x6f2   : > { %1234 = vmatprep.subr.bf16.mxu1 %v2769_v34 }
 0x6f5   : > { %1235 = vmatpush1.bf16.msra.mxu1 %v2767_v35 }
 0x6f6   : > { %1236 = vmatprep.subr.bf16.mxu1 %v2773_v17 }
 0x6f9   : > { %1237 = vmatpush1.bf16.msra.mxu1 %v2771_v18  ;;  %v2790_v18 = vld [vmem:[%s3669_s9] ss:$12 sps:$4 sm:$0xff]  }
 0x6fa   : > { %1238 = vmatprep.subr.bf16.mxu1 %v2777_v36  ;;  %v2792_v36 = vld [vmem:[%s3669_s9 + $0x4] ss:$12 sps:$4 sm:$0xff]  }
 0x6fd   : > { %1239 = vmatpush1.bf16.msra.mxu1 %v2775_v37  ;;  %v2796_v37 = vld [vmem:[%s3669_s9 + $0x1c] ss:$12 sps:$4 sm:$0xff]  }
 0x6fe   : > { %1240 = vmatprep.subr.bf16.mxu1 %v2781_v38  ;;  %v2794_v38 = vld [vmem:[%s3669_s9 + $0x18] ss:$12 sps:$4 sm:$0xff]  }
 0x701   : > { %1241 = vmatpush1.bf16.msra.mxu1 %v2779_v39  ;;  %v2800_v39 = vld [vmem:[%s3669_s9 + $0x34] ss:$12 sps:$4 sm:$0xff]  }
 0x702   : > { %1242 = vmatprep.subr.bf16.mxu1 %v2785_v40  ;;  %v2798_v40 = vld [vmem:[%s3669_s9 + $0x30] ss:$12 sps:$4 sm:$0xff]  }
 0x705   : > { %1243 = vmatpush1.bf16.msra.mxu1 %v2783_v41  ;;  %v2804_v41 = vld [vmem:[%s3669_s9 + $0x4c] ss:$12 sps:$4 sm:$0xff]  }
 0x706   : > { %2619 = vmatprep.subr.bf16.mxu1 %v2958_v1 }
 0x708   : > { %1261 = vmatmul.mubr.bf16.vlgmr.msra.gmra.mrb[12].mxu1 %v2787_v42  ;;  %v2802_v42 = vld [vmem:[%s3669_s9 + $0x48] ss:$12 sps:$4 sm:$0xff]  }
 0x709   : > { %2621 = vmatprep.mubr.msk.bf16.mxu1 %vm2959_vm0, %v2958_v1 }
 0x7bb   : > { %v990_v46 = vpop.f32.mrb[8].mxu1 }
 0x7bc   : > { %v3359_v47 = vadd.f32 %v990_v46, %v836_v45  ;;  %v2591_v48 = vpop.f32.mrb[9].mxu1  ;;  %v2812_v45 = vld [vmem:[%s3669_s9 + $0x7c] ss:$12 sps:$4 sm:$0xff]   ;;  %v2810_v46 = vld [vmem:[%s3669_s9 + $0x78] ss:$12 sps:$4 sm:$0xff]  }
 0x7bd   : > { %v993_v50 = vpop.f32.mrb[10].mxu1  ;;  %v2816_v48 = vld [vmem:[%s3669_s9 + $0x94] ss:$12 sps:$4 sm:$0xff]  }
 0x7be   : > { %v3362_v51 = vadd.f32 %v993_v50, %v837_v49  ;;  %v2592_v52 = vpop.f32.mrb[11].mxu1  ;;  %v2814_v49 = vld [vmem:[%s3669_s9 + $0x90] ss:$12 sps:$4 sm:$0xff]  }
 0x7c0   : > { %v1001_v53 = vpack.c.bf16 %v3362_v51, %v3359_v47 }
 0x7c2   : > { %2610 = vmatmul.mubr.bf16.vlgmr.msra.gmra.mrb[12].mxu0 %v1001_v53 }
 0x7c3   : > { %2615 = vmatprep.mubr.msk.bf16.mxu0 %vm2959_vm0, %v2958_v1 }
 0x7db   : > { %v1262_v59 = vpop.f32.mrb[12].mxu1 }
 0x7dc   : > { %v1263_v60 = vadd.f32 %v1262_v59, %v1135_v57  ;;  %v1264_v61 = vpop.f32.mrb[13].mxu1 }
 0x7dd   : > { %v1265_v62 = vadd.f32 %v1264_v61, %v1139_v58  ;;  %v1266_v63 = vpop.f32.mrb[14].mxu1  ;;  %v2801_v61 = vld [vmem:[%s3669_s9 + $0x38] ss:$12 sps:$4 sm:$0xff]  }
 0x7de   : > { %v1267_v0 = vadd.f32 %v1266_v63, %v1135_v57  ;;  %v1268_v2 = vpop.f32.mrb[15].mxu1  ;;  %v2809_v63 = vld [vmem:[%s3669_s9 + $0x68] ss:$12 sps:$4 sm:$0xff]  }
 0x7df   : > { %v1269_v3 = vadd.f32 %v1268_v2, %v1139_v58  ;;  %v2793_v58 = vld [vmem:[%s3669_s9 + $0x8] ss:$12 sps:$4 sm:$0xff]   ;;  %v2817_v2 = vld [vmem:[%s3669_s9 + $0x98] ss:$12 sps:$4 sm:$0xff]  }
 0x7e0   : > { %v1271_v4 = vpack.c.bf16 %v1267_v0, %v1263_v60  ;;  %v2797_v60 = vld [vmem:[%s3669_s9 + $0x20] ss:$12 sps:$4 sm:$0xff]  }
 0x7e1   : > { %v1272_v5 = vpack.c.bf16 %v1269_v3, %v1265_v62  ;;  %v2805_v62 = vld [vmem:[%s3669_s9 + $0x50] ss:$12 sps:$4 sm:$0xff]   ;;  %v2813_v0 = vld [vmem:[%s3669_s9 + $0x80] ss:$12 sps:$4 sm:$0xff]  }
 0x7e2   : > { %2614 = vmatpush3.bf16.xpose.msra.mxu0 %v1271_v4  ;;  %v2820_v3 = vld [vmem:[%s3669_s9 + $0xac] ss:$12 sps:$4 sm:$0xff]   ;;  %v2818_v4 = vld [vmem:[%s3669_s9 + $0xa8] ss:$12 sps:$4 sm:$0xff]  }
 0x7e3   : > { %2620 = vmatpush3.bf16.msra.mxu1 %v1272_v5  ;;  %1565 = vmatprep.subr.bf16.mxu0 %v2792_v36  ;;  %v2821_v5 = vld [vmem:[%s3669_s9 + $0xb0] ss:$12 sps:$4 sm:$0xff]  }
 0x7e4   : > { %2625 = vmatprep.subr.bf16.mxu1 %v2958_v1 }
 0x895   : > { %v1107_v7 = vpop.f32.mrb[12].mxu0 }
 0x896   : > { %v2611_v8 = vpop.f32.mrb[13].mxu0  ;;  %v1108_v10 = vadd.f32 %v2309_v6, %v1107_v7 }
 0x897   : > { %v1110_v9 = vpop.f32.mrb[14].mxu0 }
 0x898   : > { %v1111_v11 = vadd.f32 %v2309_v6, %v1110_v9  ;;  %v2612_v12 = vpop.f32.mrb[15].mxu0 }
 0x89a   : > { %v1273_v13 = vpack.c.bf16 %v1111_v11, %v1108_v10 }
 0x89c   : > { %2616 = vmatmul.mubr.bf16.vlgmr.msra.gmra.mrb[16].mxu0 %v1273_v13  ;;  %v1432_v13 = vsub.s32 2, %v3368_v55 }
 0x89d   : > { %1597 = vmatprep.mubr.bf16.mxu0 %v2960_v29  ;;  %1566 = vmatpush1.bf16.msra.mxu0 %v2790_v18 }
 0x89e   : > { %1567 = vmatprep.subr.bf16.mxu0 %v2796_v37 }
 0x8a1   : > { %1568 = vmatpush1.bf16.msra.mxu0 %v2794_v38 }
 0x8a2   : > { %1569 = vmatprep.subr.bf16.mxu0 %v2800_v39 }
 0x8a5   : > { %1570 = vmatpush1.bf16.msra.mxu0 %v2798_v40 }
 0x8a6   : > { %1571 = vmatprep.subr.bf16.mxu0 %v2804_v41 }
 0x8a9   : > { %1572 = vmatpush1.bf16.msra.mxu0 %v2802_v42 }
 0x8aa   : > { %1573 = vmatprep.subr.bf16.mxu0 %v2808_v43 }
 0x8ad   : > { %1574 = vmatpush1.bf16.msra.mxu0 %v2806_v44 }
 0x8ae   : > { %1575 = vmatprep.subr.bf16.mxu0 %v2812_v45 }
 0x8b1   : > { %1576 = vmatpush1.bf16.msra.mxu0 %v2810_v46 }
 0x8b2   : > { %1577 = vmatprep.subr.bf16.mxu0 %v2816_v48 }
 0x8b5   : > { %1578 = vmatpush1.bf16.msra.mxu0 %v2814_v49 }
 0x8b6   : > { %1579 = vmatprep.subr.bf16.mxu0 %v2820_v3  ;;  %v2844_v3 = vld [vmem:[%s3669_s9 + $0x13c] ss:$12 sps:$4 sm:$0xff]  }
 0x8b9   : > { %1580 = vmatpush1.bf16.msra.mxu0 %v2818_v4  ;;  %v2842_v4 = vld [vmem:[%s3669_s9 + $0x138] ss:$12 sps:$4 sm:$0xff]  }
 0x8ba   : > { %2645 = vmatprep.subr.bf16.mxu0 %v2958_v1 }
 0x96f   : > { %v1308_v14 = vpop.f32.mrb[16].mxu0 }
 0x970   : > { %v1315_v15 = vmul.f32 0.088388346, %v1308_v14  ;;  %v2617_v16 = vpop.f32.mrb[17].mxu0 }
 0x971   : > { %v1311_v19 = vpop.f32.mrb[18].mxu0 }
 0x972   : > { %v1316_v20 = vmul.f32 0.088388346, %v1311_v19  ;;  %v2618_v21 = vpop.f32.mrb[19].mxu0  ;;  %v1318_v22 = vsel %vm1317_vm2, %v1315_v15, -inf }
 0x973   : > { %1319 = vmax.xlane.f32.xlu0 %v1318_v22 }
 0x974   : > { %v1321_v23 = vsel %vm1317_vm2, %v1316_v20, -inf }
 0x975   : > { %1322 = vmax.xlane.f32.xlu1 %v1321_v23 }
 0xa00   : > { %v1320_v24 = vpop.xlane.xlu0 %1319 }
 0xa01   : > { %v1324_v25 = vsub.f32 %v1315_v15, %v1320_v24 }
 0xa02   : > { %v1323_v26 = vpop.xlane.xlu1 %1322 }
 0xa03   : > { %v1326_v27 = vmul.f32 1.442695, %v1324_v25  ;;  %v1325_v28 = vsub.f32 %v1316_v20, %v1323_v26 }
 0xa05   : > { %2870 = vpow2.f32 %v1326_v27  ;;  %v1328_v32 = vmul.f32 1.442695, %v1325_v28 }
 0xa07   : > { %2872 = vpow2.f32 %v1328_v32 }
 0xa0f   : > { %v2871_v33 = vpop.eup %2870 }
 0xa10   : > { %v1330_v34 = vsel %vm1317_vm2, %v2871_v33, 0.0 }
 0xa11   : > { %v2873_v35 = vpop.eup %2872  ;;  %1331 = vadd.xlane.f32.xlu0 %v1330_v34 }
 0xa12   : > { %v1333_v17 = vsel %vm1317_vm2, %v2873_v35, 0.0 }
 0xa13   : > { %1334 = vadd.xlane.f32.xlu1 %v1333_v17 }
 0xa9e   : > { %v1332_v50 = vpop.xlane.xlu0 %1331 }
 0xa9f   : > { %2874 = vrcp.f32 %v1332_v50 }
 0xaa0   : > { %v1335_v52 = vpop.xlane.xlu1 %1334 }
 0xaa1   : > { %2876 = vrcp.f32 %v1335_v52 }
 0xaa9   : > { %v2875_v53 = vpop.eup %2874 }
 0xaaa   : > { %v1338_v31 = vmul.f32 %v2875_v53, %v2871_v33 }
 0xaab   : > { %v2877_v54 = vpop.eup %2876 }
 0xaac   : > { %v1339_v57 = vmul.f32 %v2877_v54, %v2873_v35 }
 0xaae   : > { %v1340_v59 = vpack.c.bf16 %v1339_v57, %v1338_v31  ;;  %v2822_v31 = vld [vmem:[%s3669_s9 + $0xc0] ss:$12 sps:$4 sm:$0xff]   ;;  %v2824_v57 = vld [vmem:[%s3669_s9 + $0xc4] ss:$12 sps:$4 sm:$0xff]  }
 0xab0   : > { %2622 = vmatmul.mubr.msk.bf16.vlgmr.msra.gmra.mrb[16].mxu1 %vm1317_vm2, %v1340_v59  ;;  %v2826_v59 = vld [vmem:[%s3669_s9 + $0xd8] ss:$12 sps:$4 sm:$0xff]  }
 0xab1   : > { %2626 = vmatpush3.bf16.msra.mxu1 %v2793_v58  ;;  %2641 = vmatprep.mubr.msk.bf16.mxu1 %vm2959_vm0, %v2958_v1  ;;  %v2828_v58 = vld [vmem:[%s3669_s9 + $0xdc] ss:$12 sps:$4 sm:$0xff]  }
 0xab2   : > { %2627 = vmatprep.subr.bf16.mxu1 %v2958_v1 }
 0xab5   : > { %2628 = vmatpush3.bf16.msra.mxu1 %v2797_v60  ;;  %v2832_v60 = vld [vmem:[%s3669_s9 + $0xf4] ss:$12 sps:$4 sm:$0xff]  }
 0xab6   : > { %2629 = vmatprep.subr.bf16.mxu1 %v2958_v1 }
 0xab9   : > { %2630 = vmatpush3.bf16.msra.mxu1 %v2801_v61  ;;  %v2830_v61 = vld [vmem:[%s3669_s9 + $0xf0] ss:$12 sps:$4 sm:$0xff]  }
 0xaba   : > { %2631 = vmatprep.subr.bf16.mxu1 %v2958_v1 }
 0xabd   : > { %2632 = vmatpush3.bf16.msra.mxu1 %v2805_v62  ;;  %v2836_v62 = vld [vmem:[%s3669_s9 + $0x10c] ss:$12 sps:$4 sm:$0xff]  }
 0xabe   : > { %2633 = vmatprep.subr.bf16.mxu1 %v2958_v1 }
 0xac1   : > { %2634 = vmatpush3.bf16.msra.mxu1 %v2809_v63  ;;  %v2834_v63 = vld [vmem:[%s3669_s9 + $0x108] ss:$12 sps:$4 sm:$0xff]  }
 0xac2   : > { %2635 = vmatprep.subr.bf16.mxu1 %v2958_v1 }
 0xac5   : > { %2636 = vmatpush3.bf16.msra.mxu1 %v2813_v0  ;;  %v2840_v0 = vld [vmem:[%s3669_s9 + $0x124] ss:$12 sps:$4 sm:$0xff]  }
 0xac6   : > { %2637 = vmatprep.subr.bf16.mxu1 %v2958_v1 }
 0xac9   : > { %2638 = vmatpush3.bf16.msra.mxu1 %v2817_v2  ;;  %v2838_v2 = vld [vmem:[%s3669_s9 + $0x120] ss:$12 sps:$4 sm:$0xff]  }
 0xaca   : > { %2639 = vmatprep.subr.bf16.mxu1 %v2958_v1 }
 0xacd   : > { %2640 = vmatpush3.bf16.msra.mxu1 %v2821_v5  ;;  %v2848_v5 = vld [vmem:[%s3669_s9 + $0x154] ss:$12 sps:$4 sm:$0xff]  }
 0xace   : > { %2651 = vmatprep.subr.bf16.mxu1 %v2958_v1 }
 0xb83   : > { %v1378_v6 = vpop.f32.mrb[16].mxu1 }
 0xb84   : > { %v2623_v7 = vpop.f32.mrb[17].mxu1  ;;  %v3475_v9 = vadd.f32 %v1378_v6, %v3359_v47  ;;  %v1420_v47 = vld [vmem:[%s3670_s10] sm:$0x7]  ;;  %v2846_v6 = vld [vmem:[%s3669_s9 + $0x150] ss:$12 sps:$4 sm:$0xff]  }
 0xb85   : > { %v1381_v8 = vpop.f32.mrb[18].mxu1  ;;  %v1433_v14 = vrot.slane %v1420_v47, %v1432_v13  ;;  %v1429_v19 = vrot.slane %v1420_v47, %v3377_v56 }
 0xb86   : > { %v3478_v10 = vadd.f32 %v1381_v8, %v3362_v51  ;;  %v2624_v11 = vpop.f32.mrb[19].mxu1  ;;  %v1425_v51 = vrot.slane %v1420_v47, %v3371_v30 }
 0xb88   : > { %v1387_v12 = vpack.c.bf16 %v3478_v10, %v3475_v9 }
 0xb8a   : > { %1598 = vmatmul.mubr.bf16.vlgmr.msra.gmra.mrb[20].mxu0 %v1387_v12  ;;  %2642 = vmatmul.mubr.bf16.vlgmr.msra.gmra.mrb[20].mxu1 %v1387_v12 }
 0xb8b   : > { %2647 = vmatprep.mubr.msk.bf16.mxu0 %vm2959_vm0, %v2958_v1  ;;  %2653 = vmatprep.mubr.msk.bf16.mxu1 %vm2959_vm0, %v2958_v1 }
 0xc5d   : > { %v1599_v15 = vpop.f32.mrb[20].mxu0  ;;  %v1642_v16 = vpop.f32.mrb[20].mxu1 }
 0xc5e   : > { %v1601_v20 = vpop.f32.mrb[21].mxu0  ;;  %v2643_v21 = vpop.f32.mrb[21].mxu1  ;;  %v1600_v24 = vadd.f32 %v1599_v15, %v1425_v51  ;;  %v1643_v25 = vadd.f32 %v1642_v16, %v1433_v14  ;;  %v2829_v16 = vld [vmem:[%s3669_s9 + $0xe0] ss:$12 sps:$4 sm:$0xff]  }
 0xc5f   : > { %v1603_v22 = vpop.f32.mrb[22].mxu0  ;;  %v1645_v23 = vpop.f32.mrb[22].mxu1  ;;  %v1602_v33 = vadd.f32 %v1601_v20, %v1429_v19  ;;  %v2837_v20 = vld [vmem:[%s3669_s9 + $0x110] ss:$12 sps:$4 sm:$0xff]   ;;  %v2841_v21 = vld [vmem:[%s3669_s9 + $0x128] ss:$12 sps:$4 sm:$0xff]  }
 0xc60   : > { %v1604_v26 = vadd.f32 %v1603_v22, %v1425_v51  ;;  %v1646_v27 = vadd.f32 %v1645_v23, %v1433_v14  ;;  %v1605_v28 = vpop.f32.mrb[23].mxu0  ;;  %v2644_v32 = vpop.f32.mrb[23].mxu1  ;;  %v2825_v14 = vld [vmem:[%s3669_s9 + $0xc8] ss:$12 sps:$4 sm:$0xff]   ;;  %v2845_v22 = vld [vmem:[%s3669_s9 + $0x140] ss:$12 sps:$4 sm:$0xff]  }
 0xc61   : > { %v1606_v34 = vadd.f32 %v1605_v28, %v1429_v19  ;;  %v2833_v19 = vld [vmem:[%s3669_s9 + $0xf8] ss:$12 sps:$4 sm:$0xff]  }
 0xc62   : > { %v1651_v35 = vpack.c.bf16 %v1604_v26, %v1600_v24  ;;  %v1650_v17 = vpack.c.bf16 %v1646_v27, %v1643_v25  ;;  %v2849_v23 = vld [vmem:[%s3669_s9 + $0x158] ss:$12 sps:$4 sm:$0xff]   ;;  %v2850_v25 = vld [vmem:[%s3669_s9 + $0x168] ss:$12 sps:$4 sm:$0xff]   ;;  %v2853_v26 = vld [vmem:[%s3669_s9 + $0x170] ss:$12 sps:$4 sm:$0xff]  }
 0xc63   : > { %v1649_v18 = vpack.c.bf16 %v1606_v34, %v1602_v33  ;;  %v2852_v24 = vld [vmem:[%s3669_s9 + $0x16c] ss:$12 sps:$4 sm:$0xff]  }
 0xc64   : > { %2652 = vmatpush3.bf16.msra.mxu1 %v1650_v17 }
 0xc65   : > { %2646 = vmatpush3.bf16.xpose.msra.mxu0 %v1649_v18  ;;  %2657 = vmatprep.subr.bf16.mxu1 %v2958_v1 }
 0xc66   : > { %1944 = vmatprep.subr.bf16.mxu0 %v2824_v57 }
 0xc6c   : > { %2648 = vmatmul.mubr.bf16.vlgmr.msra.gmra.mrb[24].mxu0 %v1651_v35 }
 0xc6d   : > { %1976 = vmatprep.mubr.bf16.mxu0 %v2960_v29  ;;  %1945 = vmatpush1.bf16.msra.mxu0 %v2822_v31 }
 0xc6e   : > { %1946 = vmatprep.subr.bf16.mxu0 %v2828_v58 }
 0xc71   : > { %1947 = vmatpush1.bf16.msra.mxu0 %v2826_v59 }
 0xc72   : > { %1948 = vmatprep.subr.bf16.mxu0 %v2832_v60 }
 0xc75   : > { %1949 = vmatpush1.bf16.msra.mxu0 %v2830_v61 }
 0xc76   : > { %1950 = vmatprep.subr.bf16.mxu0 %v2836_v62 }
 0xc79   : > { %1951 = vmatpush1.bf16.msra.mxu0 %v2834_v63 }
 0xc7a   : > { %1952 = vmatprep.subr.bf16.mxu0 %v2840_v0 }
 0xc7d   : > { %1953 = vmatpush1.bf16.msra.mxu0 %v2838_v2 }
 0xc7e   : > { %1954 = vmatprep.subr.bf16.mxu0 %v2844_v3 }
 0xc81   : > { %1955 = vmatpush1.bf16.msra.mxu0 %v2842_v4 }
 0xc82   : > { %1956 = vmatprep.subr.bf16.mxu0 %v2848_v5 }
 0xc85   : > { %1957 = vmatpush1.bf16.msra.mxu0 %v2846_v6 }
 0xc86   : > { %1958 = vmatprep.subr.bf16.mxu0 %v2852_v24 }
 0xc89   : > { %1959 = vmatpush1.bf16.msra.mxu0 %v2850_v25 }
 0xc8a   : > { %2677 = vmatprep.subr.bf16.mxu0 %v2958_v1 }
 0xd3f   : > { %v1686_v36 = vpop.f32.mrb[24].mxu0 }
 0xd40   : > { %v1693_v37 = vmul.f32 0.088388346, %v1686_v36  ;;  %v2649_v38 = vpop.f32.mrb[25].mxu0 }
 0xd41   : > { %v1689_v39 = vpop.f32.mrb[26].mxu0 }
 0xd42   : > { %v1694_v40 = vmul.f32 0.088388346, %v1689_v39  ;;  %v2650_v41 = vpop.f32.mrb[27].mxu0  ;;  %v1695_v42 = vsel %vm1317_vm2, %v1693_v37, -inf }
 0xd43   : > { %1696 = vmax.xlane.f32.xlu0 %v1695_v42 }
 0xd44   : > { %v1698_v43 = vsel %vm1317_vm2, %v1694_v40, -inf }
 0xd45   : > { %1699 = vmax.xlane.f32.xlu1 %v1698_v43 }
 0xdd0   : > { %v1697_v44 = vpop.xlane.xlu0 %1696 }
 0xdd1   : > { %v1701_v45 = vsub.f32 %v1693_v37, %v1697_v44 }
 0xdd2   : > { %v1700_v46 = vpop.xlane.xlu1 %1699 }
 0xdd3   : > { %v1703_v48 = vmul.f32 1.442695, %v1701_v45  ;;  %v1702_v49 = vsub.f32 %v1694_v40, %v1700_v46 }
 0xdd5   : > { %2878 = vpow2.f32 %v1703_v48  ;;  %v1705_v50 = vmul.f32 1.442695, %v1702_v49 }
 0xdd7   : > { %2880 = vpow2.f32 %v1705_v50 }
 0xddf   : > { %v2879_v29 = vpop.eup %2878 }
 0xde0   : > { %v1707_v52 = vsel %vm1317_vm2, %v2879_v29, 0.0 }
 0xde1   : > { %v2881_v53 = vpop.eup %2880  ;;  %1708 = vadd.xlane.f32.xlu0 %v1707_v52 }
 0xde2   : > { %v1710_v54 = vsel %vm1317_vm2, %v2881_v53, 0.0 }
 0xde3   : > { %1711 = vadd.xlane.f32.xlu1 %v1710_v54 }
 0xe6e   : > { %v1709_v7 = vpop.xlane.xlu0 %1708 }
 0xe6f   : > { %2882 = vrcp.f32 %v1709_v7 }
 0xe70   : > { %v1712_v8 = vpop.xlane.xlu1 %1711 }
 0xe71   : > { %2884 = vrcp.f32 %v1712_v8 }
 0xe79   : > { %v2883_v11 = vpop.eup %2882 }
 0xe7a   : > { %v1715_v47 = vmul.f32 %v2883_v11, %v2879_v29 }
 0xe7b   : > { %v2885_v12 = vpop.eup %2884 }
 0xe7c   : > { %v1716_v51 = vmul.f32 %v2885_v12, %v2881_v53 }
 0xe7e   : > { %v1717_v15 = vpack.c.bf16 %v1716_v51, %v1715_v47 }
 0xe80   : > { %2654 = vmatmul.mubr.msk.bf16.vlgmr.msra.gmra.mrb[24].mxu1 %vm1317_vm2, %v1717_v15 }
 0xe81   : > { %2658 = vmatpush3.bf16.msra.mxu1 %v2825_v14  ;;  %2673 = vmatprep.mubr.msk.bf16.mxu1 %vm2959_vm0, %v2958_v1 }
 0xe82   : > { %2659 = vmatprep.subr.bf16.mxu1 %v2958_v1 }
 0xe85   : > { %2660 = vmatpush3.bf16.msra.mxu1 %v2829_v16 }
 0xe86   : > { %2661 = vmatprep.subr.bf16.mxu1 %v2958_v1 }
 0xe89   : > { %2662 = vmatpush3.bf16.msra.mxu1 %v2833_v19 }
 0xe8a   : > { %2663 = vmatprep.subr.bf16.mxu1 %v2958_v1 }
 0xe8d   : > { %2664 = vmatpush3.bf16.msra.mxu1 %v2837_v20 }
 0xe8e   : > { %2665 = vmatprep.subr.bf16.mxu1 %v2958_v1 }
 0xe91   : > { %2666 = vmatpush3.bf16.msra.mxu1 %v2841_v21 }
 0xe92   : > { %2667 = vmatprep.subr.bf16.mxu1 %v2958_v1 }
 0xe95   : > { %2668 = vmatpush3.bf16.msra.mxu1 %v2845_v22 }
 0xe96   : > { %2669 = vmatprep.subr.bf16.mxu1 %v2958_v1 }
 0xe99   : > { %2670 = vmatpush3.bf16.msra.mxu1 %v2849_v23 }
 0xe9a   : > { %2671 = vmatprep.subr.bf16.mxu1 %v2958_v1 }
 0xe9d   : > { %2672 = vmatpush3.bf16.msra.mxu1 %v2853_v26 }
 0xe9e   : > { %2683 = vmatprep.subr.bf16.mxu1 %v2958_v1 }
 0xf53   : > { %v1755_v27 = vpop.f32.mrb[24].mxu1 }
 0xf54   : > { %v2655_v28 = vpop.f32.mrb[25].mxu1  ;;  %v3585_v33 = vadd.f32 %v1755_v27, %v3475_v9  ;;  %v2393_v9 = vld [vmem:[%s3670_s10 + $0x3] sm:$0x7] }
 0xf55   : > { %v1758_v32 = vpop.f32.mrb[26].mxu1  ;;  %v1804_v18 = vrot.slane %v2393_v9, %v3371_v30  ;;  %v1808_v38 = vrot.slane %v2393_v9, %v3377_v56 }
 0xf56   : > { %v3588_v34 = vadd.f32 %v1758_v32, %v3478_v10  ;;  %v2656_v35 = vpop.f32.mrb[27].mxu1  ;;  %v1812_v10 = vrot.slane %v2393_v9, %v1432_v13 }
 0xf58   : > { %v1764_v17 = vpack.c.bf16 %v3588_v34, %v3585_v33 }
 0xf5a   : > { %1977 = vmatmul.mubr.bf16.vlgmr.msra.gmra.mrb[28].mxu0 %v1764_v17  ;;  %2674 = vmatmul.mubr.bf16.vlgmr.msra.gmra.mrb[28].mxu1 %v1764_v17 }
 0xf5b   : > { %2679 = vmatprep.mubr.msk.bf16.mxu0 %vm2959_vm0, %v2958_v1  ;;  %2685 = vmatprep.mubr.msk.bf16.mxu1 %vm2959_vm0, %v2958_v1 }
0x102d   : > { %v1978_v36 = vpop.f32.mrb[28].mxu0  ;;  %v2021_v37 = vpop.f32.mrb[28].mxu1 }
0x102e   : > { %v1980_v39 = vpop.f32.mrb[29].mxu0  ;;  %v2675_v40 = vpop.f32.mrb[29].mxu1  ;;  %v1979_v43 = vadd.f32 %v1978_v36, %v1804_v18  ;;  %v2022_v44 = vadd.f32 %v2021_v37, %v1812_v10 }
0x102f   : > { %v1982_v41 = vpop.f32.mrb[30].mxu0  ;;  %v2024_v42 = vpop.f32.mrb[30].mxu1  ;;  %v1981_v49 = vadd.f32 %v1980_v39, %v1808_v38 }
0x1030   : > { %v1983_v1 = vadd.f32 %v1982_v41, %v1804_v18  ;;  %v2025_v45 = vadd.f32 %v2024_v42, %v1812_v10  ;;  %v1984_v46 = vpop.f32.mrb[31].mxu0  ;;  %v2676_v48 = vpop.f32.mrb[31].mxu1 }
0x1031   : > { %v1985_v50 = vadd.f32 %v1984_v46, %v1808_v38 }
0x1032   : > { %v2030_v30 = vpack.c.bf16 %v1983_v1, %v1979_v43  ;;  %v2029_v29 = vpack.c.bf16 %v2025_v45, %v2022_v44 }
0x1033   : > { %v2028_v55 = vpack.c.bf16 %v1985_v50, %v1981_v49 }
0x1034   : > { %2684 = vmatpush3.bf16.msra.mxu1 %v2029_v29 }
0x1035   : > { %2678 = vmatpush3.bf16.xpose.msra.mxu0 %v2028_v55 }
0x103c   : > { %2680 = vmatmul.mubr.bf16.vlgmr.msra.gmra.mrb[32].mxu0 %v2030_v30 }
0x110f   : > { %v2065_v13 = vpop.f32.mrb[32].mxu0 }
0x1110   : > { %v2072_v56 = vmul.f32 0.088388346, %v2065_v13  ;;  %v2681_v52 = vpop.f32.mrb[33].mxu0 }
0x1111   : > { %v2068_v53 = vpop.f32.mrb[34].mxu0 }
0x1112   : > { %v2073_v54 = vmul.f32 0.088388346, %v2068_v53  ;;  %v2682_v31 = vpop.f32.mrb[35].mxu0  ;;  %v2074_v57 = vsel %vm1317_vm2, %v2072_v56, -inf }
0x1113   : > { %2075 = vmax.xlane.f32.xlu0 %v2074_v57 }
0x1114   : > { %v2077_v58 = vsel %vm1317_vm2, %v2073_v54, -inf }
0x1115   : > { %2078 = vmax.xlane.f32.xlu1 %v2077_v58 }
0x11a0   : > { %v2076_v59 = vpop.xlane.xlu0 %2075 }
0x11a1   : > { %v2080_v60 = vsub.f32 %v2072_v56, %v2076_v59 }
0x11a2   : > { %v2079_v61 = vpop.xlane.xlu1 %2078 }
0x11a3   : > { %v2082_v62 = vmul.f32 1.442695, %v2080_v60  ;;  %v2081_v63 = vsub.f32 %v2073_v54, %v2079_v61 }
0x11a5   : > { %2886 = vpow2.f32 %v2082_v62  ;;  %v2084_v0 = vmul.f32 1.442695, %v2081_v63 }
0x11a7   : > { %2888 = vpow2.f32 %v2084_v0 }
0x11af   : > { %v2887_v2 = vpop.eup %2886 }
0x11b0   : > { %v2086_v3 = vsel %vm1317_vm2, %v2887_v2, 0.0 }
0x11b1   : > { %v2889_v4 = vpop.eup %2888  ;;  %2087 = vadd.xlane.f32.xlu0 %v2086_v3 }
0x11b2   : > { %v2089_v5 = vsel %vm1317_vm2, %v2889_v4, 0.0 }
0x11b3   : > { %2090 = vadd.xlane.f32.xlu1 %v2089_v5 }
0x123e   : > { %v2088_v6 = vpop.xlane.xlu0 %2087 }
0x123f   : > { %2890 = vrcp.f32 %v2088_v6 }
0x1240   : > { %v2091_v7 = vpop.xlane.xlu1 %2090 }
0x1241   : > { %2892 = vrcp.f32 %v2091_v7 }
0x1249   : > { %v2891_v8 = vpop.eup %2890 }
0x124a   : > { %v2094_v12 = vmul.f32 %v2891_v8, %v2887_v2 }
0x124b   : > { %v2893_v11 = vpop.eup %2892 }
0x124c   : > { %v2095_v47 = vmul.f32 %v2893_v11, %v2889_v4 }
0x124e   : > { %v2096_v51 = vpack.c.bf16 %v2095_v47, %v2094_v12 }
0x1250   : > { %2686 = vmatmul.mubr.msk.bf16.vlgmr.msra.gmra.mrb[32].mxu1 %vm1317_vm2, %v2096_v51 }
0x1323   : > { %v2134_v14 = vpop.f32.mrb[32].mxu1 }
0x1324   : > { %v2141_v15 = vadd.f32 %v2134_v14, %v3585_v33  ;;  %v2687_v16 = vpop.f32.mrb[33].mxu1 }
0x1325   : > { %v2137_v19 = vpop.f32.mrb[34].mxu1 }
0x1326   : > { %2143 = vst [vmem:[%s409_s13] sm:$0xff] %v2141_v15  ;;  %v2142_v20 = vadd.f32 %v2137_v19, %v3588_v34  ;;  %v2688_v21 = vpop.f32.mrb[35].mxu1 }
0x1328   : > { %2144 = vst [vmem:[%s409_s13 + $0x8] sm:$0xff] %v2142_v20 }
0x1329   : > { %2907 = shalt.err (!%p2904_p3)
}
0x132a   : > { %s2908_s30 = scalar_lea.hbm %s3616_s16, 256  ;;  %s2912_s0 = scalar_lea.hbm %s3671_s11, 512 }
0x132b   : > { %p2909_p4 = scmp.ne.s32.totalorder %s3616_s16, %s2908_s30  ;;  %p2913_p9 = scmp.lt.u32.totalorder %s3616_s16, %s3671_s11 }
0x132c   : > { %p2914_p10 = scmp.lt.u32.totalorder %s2912_s0, %s2908_s30  ;;  %p2916_p12 = scmp.lt.u32.totalorder %s2908_s30, %s3616_s16 }
0x132d   : > { %p2910_p7 = pnand %p2909_p4, %p3062_p5 }
0x132e   : > { %p2915_p11 = por %p2914_p10, %p2913_p9 }
0x132f   : > { %p2911_p8 = pneg %p2910_p7 }
0x1330   : > { %p2917_p13 = por %p2916_p12, %p2915_p11 }
0x1332   : > { %p2918_p0 = pnand %p2917_p13, %p2911_p8 }
0x1334   : > { %2921 = shalt.err (!%p2918_p0)
}
0x1335   : > { %s2962_s22 = smov 128   ;;  %s2963_s25 = smov 8  }
0x1336   : > { %2689 = dma.vmem_to_hbm [thread:$0]  (%p3062_p5), %s3611_s14, 256, %s3616_s16, %s3619_s21, %s2962_s22, %s2962_s22, %s2963_s25  }
0x1337 PF: > { %p2695_p1 = scmp.ge.s32.totalorder %s2956_s20, 2  ;;  %s2174_s29 = sand.u32 1, %s2944_s17  }
0x1338   : > { %s2175_s30 = scalar_lea.sflag [#allocation3], %s2174_s29 }
0x1339   : > { %p2692_p2 = pnand %p2695_p1, %p3066_p6 }
0x133b   : > { %2939 = dma.done.wait (!%p2692_p2), %s2175_s30, 256  }
0x133c   : > { %2941 = vsyncadd (!%p2692_p2), %s2175_s30, 4294967040  ;;  %p21_p3 = scmp.ge.s32.totalorder %s3049_s23, 4   ;;  %s3676_s17 = smov %s2948_s18 }
0x133d   : > { %s3677_s18 = smov %s2952_s19  ;;  %s3678_s19 = smov %s3060_s26 }
0x133e   : > { %s3679_s20 = smov %s3049_s23  ;;  %23 = sbr.rel (!%p21_p3) target bundleno = 5 (0x5), region = 109 }
0x1345   :  { %2180 = vsyncpa [#allocation3], 1 }
0x1346   :  { %2182 = vsyncpa [#allocation3 + $0x1], 1 }

</bundles_post_ra>
